<compile_context>
chip_gen: v6e
topology: v6e:2x2x1
jax: 0.10.0
libtpu: 0.0.40
codegen_flags: <defaults>
</compile_context>

<pallas_src>
import functools

import jax
import jax.numpy as jnp
from jax.experimental import pallas as pl
from jax.experimental.pallas import tpu as pltpu

LN_EPS = 1e-5     # layer_norm_eps
POS_EPS = 1e-8    # PositionNorm eps
NEG_INF = -1e9    # additive key-mask bias (scores kept in f32)


# ---------------------------------------------------------------------------
# helpers (traced inside the kernel)
# ---------------------------------------------------------------------------
def _layernorm(h, gamma, beta, eps=LN_EPS):
    mean = jnp.mean(h, axis=-1, keepdims=True)
    var = jnp.mean((h - mean) ** 2, axis=-1, keepdims=True)
    return (h - mean) * jax.lax.rsqrt(var + eps) * gamma + beta


# ---------------------------------------------------------------------------
# Fused kernel: one grid step == TB batch elements.
# ---------------------------------------------------------------------------
def _fused_layer_kernel(*refs, num_heads, last_layer, offs):
    if last_layer:
        (x_ref, mask_ref, kbias_ref, pos_ref,
         wqkv_ref, wo_ref, w1_ref, w2_ref, wposr_ref, vecs_ref,
         x_out_ref, pos_out_ref) = refs
    else:
        (x_ref, mask_ref, kbias_ref, pos_ref, y_ref,
         wqkv_ref, wo_ref, w1_ref, w2_ref, wposr_ref,
         wy_ref, wxy_ref, wy1_ref, wy2_ref, vecs_ref,
         x_out_ref, pos_out_ref, y_out_ref) = refs

    TB, N, Dx = x_ref.shape
    H = num_heads
    dh = Dx // H
    R = TB * N          # flattened matmul rows
    G = H * TB          # attention batch (head-major)

    def vec(name):      # static, 128-aligned slice of the packed vector input
        off, ln = offs[name]
        return vecs_ref[:, off:off + ln]            # [1, ln] f32

    x3 = x_ref[...]                                  # [TB, N, Dx] f32
    x = x3.reshape(R, Dx)
    mask3 = mask_ref[...]                            # [TB, N, 1]  f32
    maskf = mask3.reshape(R, 1)
    inv_msum = 1.0 / (jnp.sum(mask3, axis=1, keepdims=True) + 1e-9)   # [TB,1,1]

    # ---- fused QKV projection: one MXU push on [R, Dx] (scale pre-folded in Q)
    qkv = jnp.dot(x.astype(jnp.bfloat16), wqkv_ref[...],
                  preferred_element_type=jnp.float32) + vec("bqkv")   # [R, 3Dx]

    # ---- head split -> [G, N, dh] (batch order = (head, batch-in-block))
    def to_heads(col0):
        parts = [qkv[:, col0 + h * dh: col0 + (h + 1) * dh].reshape(TB, N, dh)
                 for h in range(H)]
        return jnp.stack(parts, axis=0).reshape(G, N, dh).astype(jnp.bfloat16)

    qh = to_heads(0)
    kh = to_heads(Dx)
    vh = to_heads(2 * Dx)

    # ---- batched masked attention (scores / softmax in f32)
    s = jnp.einsum('gqd,gkd->gqk', qh, kh,
                   preferred_element_type=jnp.float32)               # [G, N, N]
    kb = jnp.broadcast_to(kbias_ref[...][None], (H, TB, 1, N)).reshape(G, 1, N)
    s = s + kb                                       # mask padded key nodes
    s = s - jnp.max(s, axis=-1, keepdims=True)
    p = jnp.exp(s)
    p = p * pl.reciprocal(jnp.sum(p, axis=-1, keepdims=True), approx=True)
    ctxh = jnp.einsum('gqk,gkd->gqd', p.astype(jnp.bfloat16), vh,
                      preferred_element_type=jnp.float32)            # [G, N, dh]

    ctx4 = ctxh.reshape(H, TB, N, dh)
    ctx = jnp.concatenate([ctx4[h] for h in range(H)], axis=-1)      # [TB, N, Dx]
    ctx = ctx.reshape(R, Dx)

    attn_x = jnp.dot(ctx.astype(jnp.bfloat16), wo_ref[...],
                     preferred_element_type=jnp.float32) + vec("bo") # [R, Dx]

    # ---- position branch: composed (wo.wpos) scale + PositionNorm + mask
    pos_scale = jnp.sum(ctx * wposr_ref[...], axis=-1, keepdims=True) \
        + vec("bpos")                                                # [R, 1]
    pos3 = pos_ref[...]                                              # [TB, N, 3]
    new_pos = pos3 * (1.0 + pos_scale.reshape(TB, N, 1))
    norm = jnp.sqrt(jnp.sum(new_pos * new_pos, axis=-1, keepdims=True) + 1e-12)
    mean_norm = jnp.sum(norm * mask3, axis=1, keepdims=True) * inv_msum  # [TB,1,1]
    pos_out_ref[...] = new_pos / (mean_norm + POS_EPS) * mask3       # DataHolder.mask()

    # ---- node-feature path: LN(x + attn) -> FFN(relu) -> LN, then mask()
    h1 = _layernorm(x + attn_x, vec("ln1_g"), vec("ln1_b"))
    ff = jnp.maximum(
        jnp.dot(h1.astype(jnp.bfloat16), w1_ref[...],
                preferred_element_type=jnp.float32) + vec("b1"), 0.0)
    ff = jnp.dot(ff.astype(jnp.bfloat16), w2_ref[...],
                 preferred_element_type=jnp.float32) + vec("b2")
    x2 = _layernorm(h1 + ff, vec("ln2_g"), vec("ln2_b")) * maskf
    x_out_ref[...] = x2.reshape(TB, N, Dx)

    # ---- diffusion-time (global) path, fused into the same grid step
    if not last_layer:
        attn3 = attn_x.reshape(TB, N, Dx)
        pooled = jnp.sum(attn3 * mask3, axis=1) * inv_msum.reshape(TB, 1)  # [TB, Dx]
        y = y_ref[...]                                                     # [TB, Dy]
        t_y = (jnp.dot(y, wy_ref[...], preferred_element_type=jnp.float32)
               + vec("by")
               + jnp.dot(pooled, wxy_ref[...], preferred_element_type=jnp.float32))
        hy = _layernorm(y + t_y, vec("lny1_g"), vec("lny1_b"))
        ffy = jnp.maximum(
            jnp.dot(hy, wy1_ref[...], preferred_element_type=jnp.float32)
            + vec("by1"), 0.0)
        ffy = jnp.dot(ffy, wy2_ref[...],
                      preferred_element_type=jnp.float32) + vec("by2")
        y_out_ref[...] = _layernorm(hy + ffy, vec("lny2_g"), vec("lny2_b"))


# ---------------------------------------------------------------------------
# Parameter preparation (one-time, outside jit): scale folding, wpos
# composition, bf16 weight casts, packed 1-row vector slab.
# ---------------------------------------------------------------------------
def _pack_vectors(named):
    """Pack [1, L] vectors into one [1, K] f32 slab with 128-aligned segments."""
    offs, parts, cur = {}, [], 0
    for name, v in named:
        v = jnp.asarray(v, jnp.float32).reshape(1, -1)
        L = int(v.shape[-1])
        Lp = ((L + 127) // 128) * 128
        parts.append(jnp.pad(v, ((0, 0), (0, Lp - L))))
        offs[name] = (cur, L)
        cur += Lp
    return jnp.concatenate(parts, axis=-1), offs


def prepare_params(params, *, num_heads, last_layer=False):
    Dx = params["wo"].shape[0]
    dh = Dx // num_heads
    scale = float(dh) ** -0.5

    # fold softmax 1/sqrt(dh) into the Q projection columns (zero runtime cost)
    qscale = jnp.concatenate([jnp.full((1, Dx), scale, jnp.float32),
                              jnp.ones((1, 2 * Dx), jnp.float32)], axis=-1)
    wqkv = params["wqkv"] * qscale
    bqkv = params["bqkv"] * qscale

    # compose wo . wpos so pos_scale reads directly off ctx (exact rewrite)
    wpos_row = (params["wo"] @ params["wpos"]).reshape(1, Dx)
    bpos_eff = params["bo"] @ params["wpos"] + params["bpos"]        # [1, 1]

    vec_list = [("bqkv", bqkv), ("bo", params["bo"]), ("bpos", bpos_eff),
                ("b1", params["b1"]), ("b2", params["b2"]),
                ("ln1_g", params["ln1_g"]), ("ln1_b", params["ln1_b"]),
                ("ln2_g", params["ln2_g"]), ("ln2_b", params["ln2_b"])]
    if not last_layer:
        vec_list += [("by", params["by"]), ("by1", params["by1"]),
                     ("by2", params["by2"]),
                     ("lny1_g", params["lny1_g"]), ("lny1_b", params["lny1_b"]),
                     ("lny2_g", params["lny2_g"]), ("lny2_b", params["lny2_b"])]
    vecs, offs = _pack_vectors(vec_list)

    prepared = {"wqkv": wqkv.astype(jnp.bfloat16),
                "wo": params["wo"].astype(jnp.bfloat16),
                "w1": params["w1"].astype(jnp.bfloat16),
                "w2": params["w2"].astype(jnp.bfloat16),
                "wpos_row": wpos_row.astype(jnp.float32),
                "vecs": vecs}
    if not last_layer:
        prepared.update({"wy": params["wy"].astype(jnp.float32),
                         "wxy": params["wxy"].astype(jnp.float32),
                         "wy1": params["wy1"].astype(jnp.float32),
                         "wy2": params["wy2"].astype(jnp.float32)})
    return prepared, offs


# ---------------------------------------------------------------------------
# Wrapper
# ---------------------------------------------------------------------------
def _rep_spec(shape):
    nd = len(shape)
    return pl.BlockSpec(shape, lambda b, _nd=nd: (0,) * _nd)


def _pick_tb(B, N, requested=None):
    # target ~128 matmul rows per grid step (fills v5e's 128-wide MXU; fine on
    # v6e/v7x).  2-D (batch, feature) blocks need the second-minor dim to be a
    # multiple of 8 or the full (padded) batch.
    tb = requested if requested is not None else max(1, 128 // max(N, 1))
    tb = max(1, min(tb, B))
    if tb < B and tb % 8:
        tb = min(B, ((tb + 7) // 8) * 8)
    return tb


def transformer_layer(node_features, diffusion_time, positions, node_mask,
                      prepared, *, offsets, num_heads, last_layer=False,
                      batch_block=None):
    """Forward pass of TransformerLayer (dropout = identity / eval mode)."""
    B, N, Dx = node_features.shape
    Dy = diffusion_time.shape[-1]
    TB = _pick_tb(B, N, batch_block)
    B_pad = ((B + TB - 1) // TB) * TB
    pad = B_pad - B

    x = node_features.astype(jnp.float32)
    pos = positions.astype(jnp.float32)
    maskf = node_mask.astype(jnp.float32)                       # [B, N]
    # additive key-mask bias precomputed once (lane-major [B, 1, N])
    kbias = jnp.where(maskf > 0.5, 0.0, NEG_INF)[:, None, :]
    mask3 = maskf[..., None]                                    # [B, N, 1]
    y = diffusion_time.astype(jnp.float32)                      # [B, Dy]

    if pad:
        def zf(a):
            return jnp.pad(a, [(0, pad)] + [(0, 0)] * (a.ndim - 1))
        x, mask3, kbias, pos, y = map(zf, (x, mask3, kbias, pos, y))

    grid = (B_pad // TB,)

    data = [x, mask3, kbias, pos]
    data_specs = [pl.BlockSpec((TB, N, Dx), lambda b: (b, 0, 0)),
                  pl.BlockSpec((TB, N, 1), lambda b: (b, 0, 0)),
                  pl.BlockSpec((TB, 1, N), lambda b: (b, 0, 0)),
                  pl.BlockSpec((TB, N, 3), lambda b: (b, 0, 0))]
    if not last_layer:
        data.append(y)
        data_specs.append(pl.BlockSpec((TB, Dy), lambda b: (b, 0)))

    if last_layer:
        wnames = ("wqkv", "wo", "w1", "w2", "wpos_row", "vecs")
    else:
        wnames = ("wqkv", "wo", "w1", "w2", "wpos_row",
                  "wy", "wxy", "wy1", "wy2", "vecs")
    weights = [prepared[k] for k in wnames]
    # NOTE: on v7x (64 MiB VMEM) these replicated weights could additionally be
    # single-buffered (pipeline_mode=pl.Buffered(1)); left at defaults here.
    w_specs = [_rep_spec(w.shape) for w in weights]

    out_shapes = [jax.ShapeDtypeStruct((B_pad, N, Dx), jnp.float32),
                  jax.ShapeDtypeStruct((B_pad, N, 3), jnp.float32)]
    out_specs = [pl.BlockSpec((TB, N, Dx), lambda b: (b, 0, 0)),
                 pl.BlockSpec((TB, N, 3), lambda b: (b, 0, 0))]
    if not last_layer:
        out_shapes.append(jax.ShapeDtypeStruct((B_pad, Dy), jnp.float32))
        out_specs.append(pl.BlockSpec((TB, Dy), lambda b: (b, 0)))

    kernel = functools.partial(_fused_layer_kernel, num_heads=num_heads,
                               last_layer=last_layer, offs=offsets)

    outs = pl.pallas_call(
        kernel,
        grid=grid,
        in_specs=data_specs + w_specs,
        out_specs=tuple(out_specs),
        out_shape=tuple(out_shapes),
        # batch blocks are independent -> let v7x shard across its 2 TCs
        compiler_params=pltpu.CompilerParams(
            dimension_semantics=("parallel",),
            vmem_limit_bytes=48 * 1024 * 1024),
    )(*data, *weights)

    if last_layer:
        x_out, pos_out = outs
        y_out = diffusion_time
    else:
        x_out, pos_out, y_out = outs
        y_out = y_out[:B]
    return x_out[:B], y_out, pos_out[:B], node_mask


# ---------------------------------------------------------------------------
# Deterministic parameter initialization (shapes implied by __init__)
# ---------------------------------------------------------------------------
def init_params(key, Dx, Dy, Dff, DffY):
    ks = jax.random.split(key, 12)

    def lin(k, fin, fout):
        w = jax.random.normal(k, (fin, fout), jnp.float32) / jnp.sqrt(float(fin))
        b = jnp.zeros((1, fout), jnp.float32)
        return w, b

    p = {}
    # fused QKV (== three Linear(Dx, Dx) layers stacked on columns)
    p["wqkv"], p["bqkv"] = lin(ks[0], Dx, 3 * Dx)
    p["wo"], p["bo"] = lin(ks[3], Dx, Dx)
    p["wpos"], p["bpos"] = lin(ks[4], Dx, 1)
    # node-feature FFN  (lin_node_features_1 / 2)
    p["w1"], p["b1"] = lin(ks[5], Dx, Dff)
    p["w2"], p["b2"] = lin(ks[6], Dff, Dx)
    # node-feature layer norms
    p["ln1_g"] = jnp.ones((1, Dx), jnp.float32); p["ln1_b"] = jnp.zeros((1, Dx), jnp.float32)
    p["ln2_g"] = jnp.ones((1, Dx), jnp.float32); p["ln2_b"] = jnp.zeros((1, Dx), jnp.float32)
    # diffusion-time update inside self-attention
    p["wy"], p["by"] = lin(ks[7], Dy, Dy)
    p["wxy"], _ = lin(ks[8], Dx, Dy)
    # diffusion-time FFN (lin_diffusion_time_1 / 2)
    p["wy1"], p["by1"] = lin(ks[9], Dy, DffY)
    p["wy2"], p["by2"] = lin(ks[10], DffY, Dy)
    # diffusion-time layer norms
    p["lny1_g"] = jnp.ones((1, Dy), jnp.float32); p["lny1_b"] = jnp.zeros((1, Dy), jnp.float32)
    p["lny2_g"] = jnp.ones((1, Dy), jnp.float32); p["lny2_b"] = jnp.zeros((1, Dy), jnp.float32)
    return p


# ---------------------------------------------------------------------------
if __name__ == "__main__":
    B, N = 2, 8
    Dx, Dy = 32, 16           # node_features_dimensions, diffusion_time_dimensions
    H = 4                     # num_heads
    Dff, DffY = 64, 64        # dim_ff_node_features, dim_ff_diffusion_time

    key = jax.random.PRNGKey(0)
    kx, ky, kp, kw = jax.random.split(key, 4)
    node_features = jax.random.normal(kx, (B, N, Dx), jnp.float32)
    diffusion_time = jax.random.normal(ky, (B, Dy), jnp.float32)
    positions = jax.random.normal(kp, (B, N, 3), jnp.float32)
    node_mask = jnp.array([[1.0] * N,
                           [1.0] * (N - 3) + [0.0] * 3], jnp.float32)

    params = init_params(kw, Dx, Dy, Dff, DffY)
    prepared, offsets = prepare_params(params, num_heads=H, last_layer=False)

    fwd = jax.jit(functools.partial(transformer_layer, offsets=offsets,
                                    num_heads=H, last_layer=False))
    out_x, out_y, out_pos, out_mask = fwd(
        node_features, diffusion_time, positions, node_mask, prepared)

    jax.block_until_ready((out_x, out_y, out_pos, out_mask))
    assert out_x.shape == (B, N, Dx)
    assert out_y.shape == (B, Dy)
    assert out_pos.shape == (B, N, 3)
    assert bool(jnp.all(jnp.isfinite(out_x))) and bool(jnp.all(jnp.isfinite(out_y)))
    print("KERNEL_OK")
</pallas_src>

<mosaic_0001>
module attributes {stable_mosaic.version = 11 : i64} {
  func.func @_fused_layer_kernel(%arg0: i32, %arg1: memref<2x8x32xf32, #tpu.memory_space<vmem>>, %arg2: memref<2x8x1xf32, #tpu.memory_space<vmem>>, %arg3: memref<2x1x8xf32, #tpu.memory_space<vmem>>, %arg4: memref<2x8x3xf32, #tpu.memory_space<vmem>>, %arg5: memref<2x16xf32, #tpu.memory_space<vmem>>, %arg6: memref<32x96xbf16, #tpu.memory_space<vmem>>, %arg7: memref<32x32xbf16, #tpu.memory_space<vmem>>, %arg8: memref<32x64xbf16, #tpu.memory_space<vmem>>, %arg9: memref<64x32xbf16, #tpu.memory_space<vmem>>, %arg10: memref<1x32xf32, #tpu.memory_space<vmem>>, %arg11: memref<16x16xf32, #tpu.memory_space<vmem>>, %arg12: memref<32x16xf32, #tpu.memory_space<vmem>>, %arg13: memref<16x64xf32, #tpu.memory_space<vmem>>, %arg14: memref<64x16xf32, #tpu.memory_space<vmem>>, %arg15: memref<1x2048xf32, #tpu.memory_space<vmem>>, %arg16: memref<2x8x32xf32, #tpu.memory_space<vmem>>, %arg17: memref<2x8x3xf32, #tpu.memory_space<vmem>>, %arg18: memref<2x16xf32, #tpu.memory_space<vmem>>) attributes {dimension_semantics = [#tpu.dimension_semantics<parallel>], iteration_bounds = array<i64: 1>, scalar_prefetch = 0 : i64, scratch_operands = 0 : i64, tpu.core_type = #tpu.core_type<tc>, window_params = [{transform_indices = @transform_0, window_bounds = array<i64: 2, 8, 32>}, {transform_indices = @transform_1, window_bounds = array<i64: 2, 8, 1>}, {transform_indices = @transform_2, window_bounds = array<i64: 2, 1, 8>}, {transform_indices = @transform_3, window_bounds = array<i64: 2, 8, 3>}, {transform_indices = @transform_4, window_bounds = array<i64: 2, 16>}, {pipeline_mode = #tpu.pipeline_mode<synchronous>, transform_indices = @transform_5, window_bounds = array<i64: 32, 96>}, {pipeline_mode = #tpu.pipeline_mode<synchronous>, transform_indices = @transform_6, window_bounds = array<i64: 32, 32>}, {pipeline_mode = #tpu.pipeline_mode<synchronous>, transform_indices = @transform_7, window_bounds = array<i64: 32, 64>}, {pipeline_mode = #tpu.pipeline_mode<synchronous>, transform_indices = @transform_8, window_bounds = array<i64: 64, 32>}, {pipeline_mode = #tpu.pipeline_mode<synchronous>, transform_indices = @transform_9, window_bounds = array<i64: 1, 32>}, {pipeline_mode = #tpu.pipeline_mode<synchronous>, transform_indices = @transform_10, window_bounds = array<i64: 16, 16>}, {pipeline_mode = #tpu.pipeline_mode<synchronous>, transform_indices = @transform_11, window_bounds = array<i64: 32, 16>}, {pipeline_mode = #tpu.pipeline_mode<synchronous>, transform_indices = @transform_12, window_bounds = array<i64: 16, 64>}, {pipeline_mode = #tpu.pipeline_mode<synchronous>, transform_indices = @transform_13, window_bounds = array<i64: 64, 16>}, {pipeline_mode = #tpu.pipeline_mode<synchronous>, transform_indices = @transform_14, window_bounds = array<i64: 1, 2048>}, {transform_indices = @transform_15, window_bounds = array<i64: 2, 8, 32>}, {transform_indices = @transform_16, window_bounds = array<i64: 2, 8, 3>}, {transform_indices = @transform_17, window_bounds = array<i64: 2, 16>}]} {
    %c0 = arith.constant 0 : index
    %c0_0 = arith.constant 0 : index
    %c0_1 = arith.constant 0 : index
    %0 = vector.load %arg1[%c0, %c0_0, %c0_1] : memref<2x8x32xf32, #tpu.memory_space<vmem>>, vector<2x8x32xf32>
    %1 = vector.shape_cast %0 : vector<2x8x32xf32> to vector<16x32xf32>
    %c0_2 = arith.constant 0 : index
    %c0_3 = arith.constant 0 : index
    %c0_4 = arith.constant 0 : index
    %2 = vector.load %arg2[%c0_2, %c0_3, %c0_4] : memref<2x8x1xf32, #tpu.memory_space<vmem>>, vector<2x8x1xf32>
    %3 = vector.shape_cast %2 : vector<2x8x1xf32> to vector<16x1xf32>
    %cst = arith.constant dense<0.000000e+00> : vector<2x1xf32>
    %4 = vector.multi_reduction <add>, %2, %cst [1] : vector<2x8x1xf32> to vector<2x1xf32>
    %5 = vector.shape_cast %4 : vector<2x1xf32> to vector<2x1x1xf32>
    %cst_5 = arith.constant 9.99999971E-10 : f32
    %6 = vector.broadcast %cst_5 : f32 to vector<2x1x1xf32>
    %7 = arith.addf %5, %6 : vector<2x1x1xf32>
    %cst_6 = arith.constant 1.000000e+00 : f32
    %8 = vector.broadcast %cst_6 : f32 to vector<2x1x1xf32>
    %9 = arith.divf %8, %7 : vector<2x1x1xf32>
    %10 = arith.truncf %1 : vector<16x32xf32> to vector<16x32xbf16>
    %c0_7 = arith.constant 0 : index
    %c0_8 = arith.constant 0 : index
    %11 = vector.load %arg6[%c0_7, %c0_8] : memref<32x96xbf16, #tpu.memory_space<vmem>>, vector<32x96xbf16>
    %cst_9 = arith.constant dense<0.000000e+00> : vector<16x96xf32>
    %12 = tpu.matmul %10, %11, %cst_9 {dimension_numbers = #tpu.dot_dimension_numbers<[1], [0], [0], [1], [0, 0, 1, 1], [], []>} : vector<16x32xbf16>, vector<32x96xbf16>, vector<16x96xf32> -> vector<16x96xf32>
    %c0_10 = arith.constant 0 : index
    %c0_11 = arith.constant 0 : index
    %13 = vector.load %arg15[%c0_10, %c0_11] : memref<1x2048xf32, #tpu.memory_space<vmem>>, vector<1x96xf32>
    %14 = vector.broadcast %13 : vector<1x96xf32> to vector<16x96xf32>
    %15 = arith.addf %12, %14 : vector<16x96xf32>
    %16 = vector.extract_strided_slice %15 {offsets = [0, 0], sizes = [16, 8], strides = [1, 1]} : vector<16x96xf32> to vector<16x8xf32>
    %17 = vector.shape_cast %16 : vector<16x8xf32> to vector<2x8x8xf32>
    %18 = vector.extract_strided_slice %15 {offsets = [0, 8], sizes = [16, 8], strides = [1, 1]} : vector<16x96xf32> to vector<16x8xf32>
    %19 = vector.shape_cast %18 : vector<16x8xf32> to vector<2x8x8xf32>
    %20 = vector.extract_strided_slice %15 {offsets = [0, 16], sizes = [16, 8], strides = [1, 1]} : vector<16x96xf32> to vector<16x8xf32>
    %21 = vector.shape_cast %20 : vector<16x8xf32> to vector<2x8x8xf32>
    %22 = vector.extract_strided_slice %15 {offsets = [0, 24], sizes = [16, 8], strides = [1, 1]} : vector<16x96xf32> to vector<16x8xf32>
    %23 = vector.shape_cast %22 : vector<16x8xf32> to vector<2x8x8xf32>
    %24 = vector.shape_cast %17 : vector<2x8x8xf32> to vector<1x2x8x8xf32>
    %25 = vector.shape_cast %19 : vector<2x8x8xf32> to vector<1x2x8x8xf32>
    %26 = vector.shape_cast %21 : vector<2x8x8xf32> to vector<1x2x8x8xf32>
    %27 = vector.shape_cast %23 : vector<2x8x8xf32> to vector<1x2x8x8xf32>
    %28 = tpu.concatenate %24, %25, %26, %27 in 0 : vector<1x2x8x8xf32>, vector<1x2x8x8xf32>, vector<1x2x8x8xf32>, vector<1x2x8x8xf32> -> vector<4x2x8x8xf32>
    %29 = vector.shape_cast %28 : vector<4x2x8x8xf32> to vector<8x8x8xf32>
    %30 = arith.truncf %29 : vector<8x8x8xf32> to vector<8x8x8xbf16>
    %31 = vector.extract_strided_slice %15 {offsets = [0, 32], sizes = [16, 8], strides = [1, 1]} : vector<16x96xf32> to vector<16x8xf32>
    %32 = vector.shape_cast %31 : vector<16x8xf32> to vector<2x8x8xf32>
    %33 = vector.extract_strided_slice %15 {offsets = [0, 40], sizes = [16, 8], strides = [1, 1]} : vector<16x96xf32> to vector<16x8xf32>
    %34 = vector.shape_cast %33 : vector<16x8xf32> to vector<2x8x8xf32>
    %35 = vector.extract_strided_slice %15 {offsets = [0, 48], sizes = [16, 8], strides = [1, 1]} : vector<16x96xf32> to vector<16x8xf32>
    %36 = vector.shape_cast %35 : vector<16x8xf32> to vector<2x8x8xf32>
    %37 = vector.extract_strided_slice %15 {offsets = [0, 56], sizes = [16, 8], strides = [1, 1]} : vector<16x96xf32> to vector<16x8xf32>
    %38 = vector.shape_cast %37 : vector<16x8xf32> to vector<2x8x8xf32>
    %39 = vector.shape_cast %32 : vector<2x8x8xf32> to vector<1x2x8x8xf32>
    %40 = vector.shape_cast %34 : vector<2x8x8xf32> to vector<1x2x8x8xf32>
    %41 = vector.shape_cast %36 : vector<2x8x8xf32> to vector<1x2x8x8xf32>
    %42 = vector.shape_cast %38 : vector<2x8x8xf32> to vector<1x2x8x8xf32>
    %43 = tpu.concatenate %39, %40, %41, %42 in 0 : vector<1x2x8x8xf32>, vector<1x2x8x8xf32>, vector<1x2x8x8xf32>, vector<1x2x8x8xf32> -> vector<4x2x8x8xf32>
    %44 = vector.shape_cast %43 : vector<4x2x8x8xf32> to vector<8x8x8xf32>
    %45 = arith.truncf %44 : vector<8x8x8xf32> to vector<8x8x8xbf16>
    %46 = vector.extract_strided_slice %15 {offsets = [0, 64], sizes = [16, 8], strides = [1, 1]} : vector<16x96xf32> to vector<16x8xf32>
    %47 = vector.shape_cast %46 : vector<16x8xf32> to vector<2x8x8xf32>
    %48 = vector.extract_strided_slice %15 {offsets = [0, 72], sizes = [16, 8], strides = [1, 1]} : vector<16x96xf32> to vector<16x8xf32>
    %49 = vector.shape_cast %48 : vector<16x8xf32> to vector<2x8x8xf32>
    %50 = vector.extract_strided_slice %15 {offsets = [0, 80], sizes = [16, 8], strides = [1, 1]} : vector<16x96xf32> to vector<16x8xf32>
    %51 = vector.shape_cast %50 : vector<16x8xf32> to vector<2x8x8xf32>
    %52 = vector.extract_strided_slice %15 {offsets = [0, 88], sizes = [16, 8], strides = [1, 1]} : vector<16x96xf32> to vector<16x8xf32>
    %53 = vector.shape_cast %52 : vector<16x8xf32> to vector<2x8x8xf32>
    %54 = vector.shape_cast %47 : vector<2x8x8xf32> to vector<1x2x8x8xf32>
    %55 = vector.shape_cast %49 : vector<2x8x8xf32> to vector<1x2x8x8xf32>
    %56 = vector.shape_cast %51 : vector<2x8x8xf32> to vector<1x2x8x8xf32>
    %57 = vector.shape_cast %53 : vector<2x8x8xf32> to vector<1x2x8x8xf32>
    %58 = tpu.concatenate %54, %55, %56, %57 in 0 : vector<1x2x8x8xf32>, vector<1x2x8x8xf32>, vector<1x2x8x8xf32>, vector<1x2x8x8xf32> -> vector<4x2x8x8xf32>
    %59 = vector.shape_cast %58 : vector<4x2x8x8xf32> to vector<8x8x8xf32>
    %60 = arith.truncf %59 : vector<8x8x8xf32> to vector<8x8x8xbf16>
    "tpu.trace_start"() <{level = 10 : i32, message = "gqd,gkd->gqk"}> : () -> ()
    %cst_12 = arith.constant dense<0.000000e+00> : vector<8x8x8xf32>
    %61 = tpu.matmul %30, %45, %cst_12 {dimension_numbers = #tpu.dot_dimension_numbers<[2], [2], [1], [1], [0, 0, 0, 1, 1, 1], [0], [0]>} : vector<8x8x8xbf16>, vector<8x8x8xbf16>, vector<8x8x8xf32> -> vector<8x8x8xf32>
    "tpu.trace_stop"() : () -> ()
    %c0_13 = arith.constant 0 : index
    %c0_14 = arith.constant 0 : index
    %c0_15 = arith.constant 0 : index
    %62 = vector.load %arg3[%c0_13, %c0_14, %c0_15] : memref<2x1x8xf32, #tpu.memory_space<vmem>>, vector<2x1x8xf32>
    %63 = vector.shape_cast %62 : vector<2x1x8xf32> to vector<2x1x8xf32>
    %64 = vector.shape_cast %63 : vector<2x1x8xf32> to vector<1x2x1x8xf32>
    %65 = vector.shape_cast %64 : vector<1x2x1x8xf32> to vector<1x2x1x8xf32>
    %66 = vector.broadcast %65 : vector<1x2x1x8xf32> to vector<4x2x1x8xf32>
    %67 = vector.shape_cast %66 : vector<4x2x1x8xf32> to vector<8x1x8xf32>
    %68 = vector.broadcast %67 : vector<8x1x8xf32> to vector<8x8x8xf32>
    %69 = arith.addf %61, %68 : vector<8x8x8xf32>
    %cst_16 = arith.constant dense<0xFF800000> : vector<8x8xf32>
    %70 = vector.multi_reduction <maximumf>, %69, %cst_16 [2] : vector<8x8x8xf32> to vector<8x8xf32>
    %71 = vector.shape_cast %70 : vector<8x8xf32> to vector<8x8x1xf32>
    %72 = vector.broadcast %71 : vector<8x8x1xf32> to vector<8x8x8xf32>
    %73 = arith.subf %69, %72 : vector<8x8x8xf32>
    %74 = math.exp %73 : vector<8x8x8xf32>
    %cst_17 = arith.constant dense<0.000000e+00> : vector<8x8xf32>
    %75 = vector.multi_reduction <add>, %74, %cst_17 [2] : vector<8x8x8xf32> to vector<8x8xf32>
    %76 = vector.shape_cast %75 : vector<8x8xf32> to vector<8x8x1xf32>
    %77 = tpu.reciprocal %76 {approx = true} : vector<8x8x1xf32> -> vector<8x8x1xf32>
    %78 = vector.broadcast %77 : vector<8x8x1xf32> to vector<8x8x8xf32>
    %79 = arith.mulf %74, %78 : vector<8x8x8xf32>
    %80 = arith.truncf %79 : vector<8x8x8xf32> to vector<8x8x8xbf16>
    "tpu.trace_start"() <{level = 10 : i32, message = "gqk,gkd->gqd"}> : () -> ()
    %cst_18 = arith.constant dense<0.000000e+00> : vector<8x8x8xf32>
    %81 = tpu.matmul %80, %60, %cst_18 {dimension_numbers = #tpu.dot_dimension_numbers<[2], [1], [1], [2], [0, 0, 0, 1, 1, 2], [0], [0]>} : vector<8x8x8xbf16>, vector<8x8x8xbf16>, vector<8x8x8xf32> -> vector<8x8x8xf32>
    "tpu.trace_stop"() : () -> ()
    %82 = vector.shape_cast %81 : vector<8x8x8xf32> to vector<4x2x8x8xf32>
    %83 = vector.extract_strided_slice %82 {offsets = [0, 0, 0, 0], sizes = [1, 2, 8, 8], strides = [1, 1, 1, 1]} : vector<4x2x8x8xf32> to vector<1x2x8x8xf32>
    %84 = vector.shape_cast %83 : vector<1x2x8x8xf32> to vector<2x8x8xf32>
    %85 = vector.extract_strided_slice %82 {offsets = [1, 0, 0, 0], sizes = [1, 2, 8, 8], strides = [1, 1, 1, 1]} : vector<4x2x8x8xf32> to vector<1x2x8x8xf32>
    %86 = vector.shape_cast %85 : vector<1x2x8x8xf32> to vector<2x8x8xf32>
    %87 = vector.extract_strided_slice %82 {offsets = [2, 0, 0, 0], sizes = [1, 2, 8, 8], strides = [1, 1, 1, 1]} : vector<4x2x8x8xf32> to vector<1x2x8x8xf32>
    %88 = vector.shape_cast %87 : vector<1x2x8x8xf32> to vector<2x8x8xf32>
    %89 = vector.extract_strided_slice %82 {offsets = [3, 0, 0, 0], sizes = [1, 2, 8, 8], strides = [1, 1, 1, 1]} : vector<4x2x8x8xf32> to vector<1x2x8x8xf32>
    %90 = vector.shape_cast %89 : vector<1x2x8x8xf32> to vector<2x8x8xf32>
    %91 = tpu.concatenate %84, %86, %88, %90 in 2 : vector<2x8x8xf32>, vector<2x8x8xf32>, vector<2x8x8xf32>, vector<2x8x8xf32> -> vector<2x8x32xf32>
    %92 = vector.shape_cast %91 : vector<2x8x32xf32> to vector<16x32xf32>
    %93 = arith.truncf %92 : vector<16x32xf32> to vector<16x32xbf16>
    %c0_19 = arith.constant 0 : index
    %c0_20 = arith.constant 0 : index
    %94 = vector.load %arg7[%c0_19, %c0_20] : memref<32x32xbf16, #tpu.memory_space<vmem>>, vector<32x32xbf16>
    %cst_21 = arith.constant dense<0.000000e+00> : vector<16x32xf32>
    %95 = tpu.matmul %93, %94, %cst_21 {dimension_numbers = #tpu.dot_dimension_numbers<[1], [0], [0], [1], [0, 0, 1, 1], [], []>} : vector<16x32xbf16>, vector<32x32xbf16>, vector<16x32xf32> -> vector<16x32xf32>
    %c0_22 = arith.constant 0 : index
    %c128 = arith.constant 128 : index
    %96 = vector.load %arg15[%c0_22, %c128] : memref<1x2048xf32, #tpu.memory_space<vmem>>, vector<1x32xf32>
    %97 = vector.broadcast %96 : vector<1x32xf32> to vector<16x32xf32>
    %98 = arith.addf %95, %97 : vector<16x32xf32>
    %c0_23 = arith.constant 0 : index
    %c0_24 = arith.constant 0 : index
    %99 = vector.load %arg10[%c0_23, %c0_24] : memref<1x32xf32, #tpu.memory_space<vmem>>, vector<1x32xf32>
    %100 = vector.broadcast %99 : vector<1x32xf32> to vector<16x32xf32>
    %101 = arith.mulf %92, %100 : vector<16x32xf32>
    %cst_25 = arith.constant dense<0.000000e+00> : vector<16xf32>
    %102 = vector.multi_reduction <add>, %101, %cst_25 [1] : vector<16x32xf32> to vector<16xf32>
    %103 = vector.shape_cast %102 : vector<16xf32> to vector<16x1xf32>
    %c0_26 = arith.constant 0 : index
    %c256 = arith.constant 256 : index
    %104 = vector.load %arg15[%c0_26, %c256] : memref<1x2048xf32, #tpu.memory_space<vmem>>, vector<1x1xf32>
    %105 = vector.broadcast %104 : vector<1x1xf32> to vector<16x1xf32>
    %106 = arith.addf %103, %105 : vector<16x1xf32>
    %c0_27 = arith.constant 0 : index
    %c0_28 = arith.constant 0 : index
    %c0_29 = arith.constant 0 : index
    %107 = vector.load %arg4[%c0_27, %c0_28, %c0_29] : memref<2x8x3xf32, #tpu.memory_space<vmem>>, vector<2x8x3xf32>
    %108 = vector.shape_cast %106 : vector<16x1xf32> to vector<2x8x1xf32>
    %cst_30 = arith.constant 1.000000e+00 : f32
    %109 = vector.broadcast %cst_30 : f32 to vector<2x8x1xf32>
    %110 = arith.addf %109, %108 : vector<2x8x1xf32>
    %111 = vector.broadcast %110 : vector<2x8x1xf32> to vector<2x8x3xf32>
    %112 = arith.mulf %107, %111 : vector<2x8x3xf32>
    %113 = arith.mulf %112, %112 : vector<2x8x3xf32>
    %cst_31 = arith.constant dense<0.000000e+00> : vector<2x8xf32>
    %114 = vector.multi_reduction <add>, %113, %cst_31 [2] : vector<2x8x3xf32> to vector<2x8xf32>
    %115 = vector.shape_cast %114 : vector<2x8xf32> to vector<2x8x1xf32>
    %cst_32 = arith.constant 9.99999996E-13 : f32
    %116 = vector.broadcast %cst_32 : f32 to vector<2x8x1xf32>
    %117 = arith.addf %115, %116 : vector<2x8x1xf32>
    %118 = math.sqrt %117 : vector<2x8x1xf32>
    %119 = arith.mulf %118, %2 : vector<2x8x1xf32>
    %cst_33 = arith.constant dense<0.000000e+00> : vector<2x1xf32>
    %120 = vector.multi_reduction <add>, %119, %cst_33 [1] : vector<2x8x1xf32> to vector<2x1xf32>
    %121 = vector.shape_cast %120 : vector<2x1xf32> to vector<2x1x1xf32>
    %122 = arith.mulf %121, %9 : vector<2x1x1xf32>
    %cst_34 = arith.constant 9.99999993E-9 : f32
    %123 = vector.broadcast %cst_34 : f32 to vector<2x1x1xf32>
    %124 = arith.addf %122, %123 : vector<2x1x1xf32>
    %125 = vector.broadcast %124 : vector<2x1x1xf32> to vector<2x8x3xf32>
    %126 = arith.divf %112, %125 : vector<2x8x3xf32>
    %127 = vector.broadcast %2 : vector<2x8x1xf32> to vector<2x8x3xf32>
    %128 = arith.mulf %126, %127 : vector<2x8x3xf32>
    %c0_35 = arith.constant 0 : index
    %c0_36 = arith.constant 0 : index
    %c0_37 = arith.constant 0 : index
    %129 = vector.load %arg17[%c0_35, %c0_36, %c0_37] : memref<2x8x3xf32, #tpu.memory_space<vmem>>, vector<2x8x3xf32>
    tpu.vector_store %arg17[%c0_35, %c0_36, %c0_37], %128 {strides = array<i32>} : memref<2x8x3xf32, #tpu.memory_space<vmem>>, vector<2x8x3xf32>,
    %130 = arith.addf %1, %98 : vector<16x32xf32>
    %c0_38 = arith.constant 0 : index
    %c640 = arith.constant 640 : index
    %131 = vector.load %arg15[%c0_38, %c640] : memref<1x2048xf32, #tpu.memory_space<vmem>>, vector<1x32xf32>
    %c0_39 = arith.constant 0 : index
    %c768 = arith.constant 768 : index
    %132 = vector.load %arg15[%c0_39, %c768] : memref<1x2048xf32, #tpu.memory_space<vmem>>, vector<1x32xf32>
    %cst_40 = arith.constant dense<0.000000e+00> : vector<16xf32>
    %133 = vector.multi_reduction <add>, %130, %cst_40 [1] : vector<16x32xf32> to vector<16xf32>
    %134 = vector.shape_cast %133 : vector<16xf32> to vector<16x1xf32>
    %cst_41 = arith.constant 3.200000e+01 : f32
    %135 = vector.broadcast %cst_41 : f32 to vector<16x1xf32>
    %136 = arith.divf %134, %135 : vector<16x1xf32>
    %137 = vector.broadcast %136 : vector<16x1xf32> to vector<16x32xf32>
    %138 = arith.subf %130, %137 : vector<16x32xf32>
    %139 = arith.mulf %138, %138 : vector<16x32xf32>
    %cst_42 = arith.constant dense<0.000000e+00> : vector<16xf32>
    %140 = vector.multi_reduction <add>, %139, %cst_42 [1] : vector<16x32xf32> to vector<16xf32>
    %141 = vector.shape_cast %140 : vector<16xf32> to vector<16x1xf32>
    %cst_43 = arith.constant 3.200000e+01 : f32
    %142 = vector.broadcast %cst_43 : f32 to vector<16x1xf32>
    %143 = arith.divf %141, %142 : vector<16x1xf32>
    %144 = vector.broadcast %136 : vector<16x1xf32> to vector<16x32xf32>
    %145 = arith.subf %130, %144 : vector<16x32xf32>
    %cst_44 = arith.constant 9.99999974E-6 : f32
    %146 = vector.broadcast %cst_44 : f32 to vector<16x1xf32>
    %147 = arith.addf %143, %146 : vector<16x1xf32>
    %148 = math.rsqrt %147 : vector<16x1xf32>
    %149 = vector.broadcast %148 : vector<16x1xf32> to vector<16x32xf32>
    %150 = arith.mulf %145, %149 : vector<16x32xf32>
    %151 = vector.broadcast %131 : vector<1x32xf32> to vector<16x32xf32>
    %152 = arith.mulf %150, %151 : vector<16x32xf32>
    %153 = vector.broadcast %132 : vector<1x32xf32> to vector<16x32xf32>
    %154 = arith.addf %152, %153 : vector<16x32xf32>
    %155 = arith.truncf %154 : vector<16x32xf32> to vector<16x32xbf16>
    %c0_45 = arith.constant 0 : index
    %c0_46 = arith.constant 0 : index
    %156 = vector.load %arg8[%c0_45, %c0_46] : memref<32x64xbf16, #tpu.memory_space<vmem>>, vector<32x64xbf16>
    %cst_47 = arith.constant dense<0.000000e+00> : vector<16x64xf32>
    %157 = tpu.matmul %155, %156, %cst_47 {dimension_numbers = #tpu.dot_dimension_numbers<[1], [0], [0], [1], [0, 0, 1, 1], [], []>} : vector<16x32xbf16>, vector<32x64xbf16>, vector<16x64xf32> -> vector<16x64xf32>
    %c0_48 = arith.constant 0 : index
    %c384 = arith.constant 384 : index
    %158 = vector.load %arg15[%c0_48, %c384] : memref<1x2048xf32, #tpu.memory_space<vmem>>, vector<1x64xf32>
    %159 = vector.broadcast %158 : vector<1x64xf32> to vector<16x64xf32>
    %160 = arith.addf %157, %159 : vector<16x64xf32>
    %cst_49 = arith.constant 0.000000e+00 : f32
    %161 = vector.broadcast %cst_49 : f32 to vector<16x64xf32>
    %162 = arith.maximumf %160, %161 : vector<16x64xf32>
    %163 = arith.truncf %162 : vector<16x64xf32> to vector<16x64xbf16>
    %c0_50 = arith.constant 0 : index
    %c0_51 = arith.constant 0 : index
    %164 = vector.load %arg9[%c0_50, %c0_51] : memref<64x32xbf16, #tpu.memory_space<vmem>>, vector<64x32xbf16>
    %cst_52 = arith.constant dense<0.000000e+00> : vector<16x32xf32>
    %165 = tpu.matmul %163, %164, %cst_52 {dimension_numbers = #tpu.dot_dimension_numbers<[1], [0], [0], [1], [0, 0, 1, 1], [], []>} : vector<16x64xbf16>, vector<64x32xbf16>, vector<16x32xf32> -> vector<16x32xf32>
    %c0_53 = arith.constant 0 : index
    %c512 = arith.constant 512 : index
    %166 = vector.load %arg15[%c0_53, %c512] : memref<1x2048xf32, #tpu.memory_space<vmem>>, vector<1x32xf32>
    %167 = vector.broadcast %166 : vector<1x32xf32> to vector<16x32xf32>
    %168 = arith.addf %165, %167 : vector<16x32xf32>
    %169 = arith.addf %154, %168 : vector<16x32xf32>
    %c0_54 = arith.constant 0 : index
    %c896 = arith.constant 896 : index
    %170 = vector.load %arg15[%c0_54, %c896] : memref<1x2048xf32, #tpu.memory_space<vmem>>, vector<1x32xf32>
    %c0_55 = arith.constant 0 : index
    %c1024 = arith.constant 1024 : index
    %171 = vector.load %arg15[%c0_55, %c1024] : memref<1x2048xf32, #tpu.memory_space<vmem>>, vector<1x32xf32>
    %cst_56 = arith.constant dense<0.000000e+00> : vector<16xf32>
    %172 = vector.multi_reduction <add>, %169, %cst_56 [1] : vector<16x32xf32> to vector<16xf32>
    %173 = vector.shape_cast %172 : vector<16xf32> to vector<16x1xf32>
    %cst_57 = arith.constant 3.200000e+01 : f32
    %174 = vector.broadcast %cst_57 : f32 to vector<16x1xf32>
    %175 = arith.divf %173, %174 : vector<16x1xf32>
    %176 = vector.broadcast %175 : vector<16x1xf32> to vector<16x32xf32>
    %177 = arith.subf %169, %176 : vector<16x32xf32>
    %178 = arith.mulf %177, %177 : vector<16x32xf32>
    %cst_58 = arith.constant dense<0.000000e+00> : vector<16xf32>
    %179 = vector.multi_reduction <add>, %178, %cst_58 [1] : vector<16x32xf32> to vector<16xf32>
    %180 = vector.shape_cast %179 : vector<16xf32> to vector<16x1xf32>
    %cst_59 = arith.constant 3.200000e+01 : f32
    %181 = vector.broadcast %cst_59 : f32 to vector<16x1xf32>
    %182 = arith.divf %180, %181 : vector<16x1xf32>
    %183 = vector.broadcast %175 : vector<16x1xf32> to vector<16x32xf32>
    %184 = arith.subf %169, %183 : vector<16x32xf32>
    %cst_60 = arith.constant 9.99999974E-6 : f32
    %185 = vector.broadcast %cst_60 : f32 to vector<16x1xf32>
    %186 = arith.addf %182, %185 : vector<16x1xf32>
    %187 = math.rsqrt %186 : vector<16x1xf32>
    %188 = vector.broadcast %187 : vector<16x1xf32> to vector<16x32xf32>
    %189 = arith.mulf %184, %188 : vector<16x32xf32>
    %190 = vector.broadcast %170 : vector<1x32xf32> to vector<16x32xf32>
    %191 = arith.mulf %189, %190 : vector<16x32xf32>
    %192 = vector.broadcast %171 : vector<1x32xf32> to vector<16x32xf32>
    %193 = arith.addf %191, %192 : vector<16x32xf32>
    %194 = vector.broadcast %3 : vector<16x1xf32> to vector<16x32xf32>
    %195 = arith.mulf %193, %194 : vector<16x32xf32>
    %196 = vector.shape_cast %195 : vector<16x32xf32> to vector<2x8x32xf32>
    %c0_61 = arith.constant 0 : index
    %c0_62 = arith.constant 0 : index
    %c0_63 = arith.constant 0 : index
    %197 = vector.load %arg16[%c0_61, %c0_62, %c0_63] : memref<2x8x32xf32, #tpu.memory_space<vmem>>, vector<2x8x32xf32>
    tpu.vector_store %arg16[%c0_61, %c0_62, %c0_63], %196 {strides = array<i32>} : memref<2x8x32xf32, #tpu.memory_space<vmem>>, vector<2x8x32xf32>,
    %198 = vector.shape_cast %98 : vector<16x32xf32> to vector<2x8x32xf32>
    %199 = vector.broadcast %2 : vector<2x8x1xf32> to vector<2x8x32xf32>
    %200 = arith.mulf %198, %199 : vector<2x8x32xf32>
    %cst_64 = arith.constant dense<0.000000e+00> : vector<2x32xf32>
    %201 = vector.multi_reduction <add>, %200, %cst_64 [1] : vector<2x8x32xf32> to vector<2x32xf32>
    %202 = vector.shape_cast %9 : vector<2x1x1xf32> to vector<2x1xf32>
    %203 = vector.broadcast %202 : vector<2x1xf32> to vector<2x32xf32>
    %204 = arith.mulf %201, %203 : vector<2x32xf32>
    %c0_65 = arith.constant 0 : index
    %c0_66 = arith.constant 0 : index
    %205 = vector.load %arg5[%c0_65, %c0_66] : memref<2x16xf32, #tpu.memory_space<vmem>>, vector<2x16xf32>
    %c0_67 = arith.constant 0 : index
    %c0_68 = arith.constant 0 : index
    %206 = vector.load %arg11[%c0_67, %c0_68] : memref<16x16xf32, #tpu.memory_space<vmem>>, vector<16x16xf32>
    %cst_69 = arith.constant dense<0.000000e+00> : vector<2x16xf32>
    %207 = tpu.matmul %205, %206, %cst_69 {dimension_numbers = #tpu.dot_dimension_numbers<[1], [0], [0], [1], [0, 0, 1, 1], [], []>} : vector<2x16xf32>, vector<16x16xf32>, vector<2x16xf32> -> vector<2x16xf32>
    %c0_70 = arith.constant 0 : index
    %c1152 = arith.constant 1152 : index
    %208 = vector.load %arg15[%c0_70, %c1152] : memref<1x2048xf32, #tpu.memory_space<vmem>>, vector<1x16xf32>
    %209 = vector.broadcast %208 : vector<1x16xf32> to vector<2x16xf32>
    %210 = arith.addf %207, %209 : vector<2x16xf32>
    %c0_71 = arith.constant 0 : index
    %c0_72 = arith.constant 0 : index
    %211 = vector.load %arg12[%c0_71, %c0_72] : memref<32x16xf32, #tpu.memory_space<vmem>>, vector<32x16xf32>
    %cst_73 = arith.constant dense<0.000000e+00> : vector<2x16xf32>
    %212 = tpu.matmul %204, %211, %cst_73 {dimension_numbers = #tpu.dot_dimension_numbers<[1], [0], [0], [1], [0, 0, 1, 1], [], []>} : vector<2x32xf32>, vector<32x16xf32>, vector<2x16xf32> -> vector<2x16xf32>
    %213 = arith.addf %210, %212 : vector<2x16xf32>
    %214 = arith.addf %205, %213 : vector<2x16xf32>
    %c0_74 = arith.constant 0 : index
    %c1536 = arith.constant 1536 : index
    %215 = vector.load %arg15[%c0_74, %c1536] : memref<1x2048xf32, #tpu.memory_space<vmem>>, vector<1x16xf32>
    %c0_75 = arith.constant 0 : index
    %c1664 = arith.constant 1664 : index
    %216 = vector.load %arg15[%c0_75, %c1664] : memref<1x2048xf32, #tpu.memory_space<vmem>>, vector<1x16xf32>
    %cst_76 = arith.constant dense<0.000000e+00> : vector<2xf32>
    %217 = vector.multi_reduction <add>, %214, %cst_76 [1] : vector<2x16xf32> to vector<2xf32>
    %218 = vector.shape_cast %217 : vector<2xf32> to vector<2x1xf32>
    %cst_77 = arith.constant 1.600000e+01 : f32
    %219 = vector.broadcast %cst_77 : f32 to vector<2x1xf32>
    %220 = arith.divf %218, %219 : vector<2x1xf32>
    %221 = vector.broadcast %220 : vector<2x1xf32> to vector<2x16xf32>
    %222 = arith.subf %214, %221 : vector<2x16xf32>
    %223 = arith.mulf %222, %222 : vector<2x16xf32>
    %cst_78 = arith.constant dense<0.000000e+00> : vector<2xf32>
    %224 = vector.multi_reduction <add>, %223, %cst_78 [1] : vector<2x16xf32> to vector<2xf32>
    %225 = vector.shape_cast %224 : vector<2xf32> to vector<2x1xf32>
    %cst_79 = arith.constant 1.600000e+01 : f32
    %226 = vector.broadcast %cst_79 : f32 to vector<2x1xf32>
    %227 = arith.divf %225, %226 : vector<2x1xf32>
    %228 = vector.broadcast %220 : vector<2x1xf32> to vector<2x16xf32>
    %229 = arith.subf %214, %228 : vector<2x16xf32>
    %cst_80 = arith.constant 9.99999974E-6 : f32
    %230 = vector.broadcast %cst_80 : f32 to vector<2x1xf32>
    %231 = arith.addf %227, %230 : vector<2x1xf32>
    %232 = math.rsqrt %231 : vector<2x1xf32>
    %233 = vector.broadcast %232 : vector<2x1xf32> to vector<2x16xf32>
    %234 = arith.mulf %229, %233 : vector<2x16xf32>
    %235 = vector.broadcast %215 : vector<1x16xf32> to vector<2x16xf32>
    %236 = arith.mulf %234, %235 : vector<2x16xf32>
    %237 = vector.broadcast %216 : vector<1x16xf32> to vector<2x16xf32>
    %238 = arith.addf %236, %237 : vector<2x16xf32>
    %c0_81 = arith.constant 0 : index
    %c0_82 = arith.constant 0 : index
    %239 = vector.load %arg13[%c0_81, %c0_82] : memref<16x64xf32, #tpu.memory_space<vmem>>, vector<16x64xf32>
    %cst_83 = arith.constant dense<0.000000e+00> : vector<2x64xf32>
    %240 = tpu.matmul %238, %239, %cst_83 {dimension_numbers = #tpu.dot_dimension_numbers<[1], [0], [0], [1], [0, 0, 1, 1], [], []>} : vector<2x16xf32>, vector<16x64xf32>, vector<2x64xf32> -> vector<2x64xf32>
    %c0_84 = arith.constant 0 : index
    %c1280 = arith.constant 1280 : index
    %241 = vector.load %arg15[%c0_84, %c1280] : memref<1x2048xf32, #tpu.memory_space<vmem>>, vector<1x64xf32>
    %242 = vector.broadcast %241 : vector<1x64xf32> to vector<2x64xf32>
    %243 = arith.addf %240, %242 : vector<2x64xf32>
    %cst_85 = arith.constant 0.000000e+00 : f32
    %244 = vector.broadcast %cst_85 : f32 to vector<2x64xf32>
    %245 = arith.maximumf %243, %244 : vector<2x64xf32>
    %c0_86 = arith.constant 0 : index
    %c0_87 = arith.constant 0 : index
    %246 = vector.load %arg14[%c0_86, %c0_87] : memref<64x16xf32, #tpu.memory_space<vmem>>, vector<64x16xf32>
    %cst_88 = arith.constant dense<0.000000e+00> : vector<2x16xf32>
    %247 = tpu.matmul %245, %246, %cst_88 {dimension_numbers = #tpu.dot_dimension_numbers<[1], [0], [0], [1], [0, 0, 1, 1], [], []>} : vector<2x64xf32>, vector<64x16xf32>, vector<2x16xf32> -> vector<2x16xf32>
    %c0_89 = arith.constant 0 : index
    %c1408 = arith.constant 1408 : index
    %248 = vector.load %arg15[%c0_89, %c1408] : memref<1x2048xf32, #tpu.memory_space<vmem>>, vector<1x16xf32>
    %249 = vector.broadcast %248 : vector<1x16xf32> to vector<2x16xf32>
    %250 = arith.addf %247, %249 : vector<2x16xf32>
    %251 = arith.addf %238, %250 : vector<2x16xf32>
    %c0_90 = arith.constant 0 : index
    %c1792 = arith.constant 1792 : index
    %252 = vector.load %arg15[%c0_90, %c1792] : memref<1x2048xf32, #tpu.memory_space<vmem>>, vector<1x16xf32>
    %c0_91 = arith.constant 0 : index
    %c1920 = arith.constant 1920 : index
    %253 = vector.load %arg15[%c0_91, %c1920] : memref<1x2048xf32, #tpu.memory_space<vmem>>, vector<1x16xf32>
    %cst_92 = arith.constant dense<0.000000e+00> : vector<2xf32>
    %254 = vector.multi_reduction <add>, %251, %cst_92 [1] : vector<2x16xf32> to vector<2xf32>
    %255 = vector.shape_cast %254 : vector<2xf32> to vector<2x1xf32>
    %cst_93 = arith.constant 1.600000e+01 : f32
    %256 = vector.broadcast %cst_93 : f32 to vector<2x1xf32>
    %257 = arith.divf %255, %256 : vector<2x1xf32>
    %258 = vector.broadcast %257 : vector<2x1xf32> to vector<2x16xf32>
    %259 = arith.subf %251, %258 : vector<2x16xf32>
    %260 = arith.mulf %259, %259 : vector<2x16xf32>
    %cst_94 = arith.constant dense<0.000000e+00> : vector<2xf32>
    %261 = vector.multi_reduction <add>, %260, %cst_94 [1] : vector<2x16xf32> to vector<2xf32>
    %262 = vector.shape_cast %261 : vector<2xf32> to vector<2x1xf32>
    %cst_95 = arith.constant 1.600000e+01 : f32
    %263 = vector.broadcast %cst_95 : f32 to vector<2x1xf32>
    %264 = arith.divf %262, %263 : vector<2x1xf32>
    %265 = vector.broadcast %257 : vector<2x1xf32> to vector<2x16xf32>
    %266 = arith.subf %251, %265 : vector<2x16xf32>
    %cst_96 = arith.constant 9.99999974E-6 : f32
    %267 = vector.broadcast %cst_96 : f32 to vector<2x1xf32>
    %268 = arith.addf %264, %267 : vector<2x1xf32>
    %269 = math.rsqrt %268 : vector<2x1xf32>
    %270 = vector.broadcast %269 : vector<2x1xf32> to vector<2x16xf32>
    %271 = arith.mulf %266, %270 : vector<2x16xf32>
    %272 = vector.broadcast %252 : vector<1x16xf32> to vector<2x16xf32>
    %273 = arith.mulf %271, %272 : vector<2x16xf32>
    %274 = vector.broadcast %253 : vector<1x16xf32> to vector<2x16xf32>
    %275 = arith.addf %273, %274 : vector<2x16xf32>
    %c0_97 = arith.constant 0 : index
    %c0_98 = arith.constant 0 : index
    %276 = vector.load %arg18[%c0_97, %c0_98] : memref<2x16xf32, #tpu.memory_space<vmem>>, vector<2x16xf32>
    tpu.vector_store %arg18[%c0_97, %c0_98], %275 {strides = array<i32>} : memref<2x16xf32, #tpu.memory_space<vmem>>, vector<2x16xf32>,
    return
  }
  func.func @transform_0(%arg0: i32) -> (i32, i32, i32) {
    %c0_i32 = arith.constant 0 : i32
    %c0_i32_0 = arith.constant 0 : i32
    %c0_i32_1 = arith.constant 0 : i32
    return %arg0, %c0_i32, %c0_i32_0 : i32, i32, i32
  }
  func.func @transform_1(%arg0: i32) -> (i32, i32, i32) {
    %c0_i32 = arith.constant 0 : i32
    %c0_i32_0 = arith.constant 0 : i32
    %c0_i32_1 = arith.constant 0 : i32
    return %arg0, %c0_i32, %c0_i32_0 : i32, i32, i32
  }
  func.func @transform_2(%arg0: i32) -> (i32, i32, i32) {
    %c0_i32 = arith.constant 0 : i32
    %c0_i32_0 = arith.constant 0 : i32
    %c0_i32_1 = arith.constant 0 : i32
    return %arg0, %c0_i32, %c0_i32_0 : i32, i32, i32
  }
  func.func @transform_3(%arg0: i32) -> (i32, i32, i32) {
    %c0_i32 = arith.constant 0 : i32
    %c0_i32_0 = arith.constant 0 : i32
    %c0_i32_1 = arith.constant 0 : i32
    return %arg0, %c0_i32, %c0_i32_0 : i32, i32, i32
  }
  func.func @transform_4(%arg0: i32) -> (i32, i32) {
    %c0_i32 = arith.constant 0 : i32
    %c0_i32_0 = arith.constant 0 : i32
    return %arg0, %c0_i32 : i32, i32
  }
  func.func @transform_5(%arg0: i32) -> (i32, i32) {
    %c0_i32 = arith.constant 0 : i32
    %c0_i32_0 = arith.constant 0 : i32
    %c0_i32_1 = arith.constant 0 : i32
    return %c0_i32, %c0_i32_0 : i32, i32
  }
  func.func @transform_6(%arg0: i32) -> (i32, i32) {
    %c0_i32 = arith.constant 0 : i32
    %c0_i32_0 = arith.constant 0 : i32
    %c0_i32_1 = arith.constant 0 : i32
    return %c0_i32, %c0_i32_0 : i32, i32
  }
  func.func @transform_7(%arg0: i32) -> (i32, i32) {
    %c0_i32 = arith.constant 0 : i32
    %c0_i32_0 = arith.constant 0 : i32
    %c0_i32_1 = arith.constant 0 : i32
    return %c0_i32, %c0_i32_0 : i32, i32
  }
  func.func @transform_8(%arg0: i32) -> (i32, i32) {
    %c0_i32 = arith.constant 0 : i32
    %c0_i32_0 = arith.constant 0 : i32
    %c0_i32_1 = arith.constant 0 : i32
    return %c0_i32, %c0_i32_0 : i32, i32
  }
  func.func @transform_9(%arg0: i32) -> (i32, i32) {
    %c0_i32 = arith.constant 0 : i32
    %c0_i32_0 = arith.constant 0 : i32
    %c0_i32_1 = arith.constant 0 : i32
    return %c0_i32, %c0_i32_0 : i32, i32
  }
  func.func @transform_10(%arg0: i32) -> (i32, i32) {
    %c0_i32 = arith.constant 0 : i32
    %c0_i32_0 = arith.constant 0 : i32
    %c0_i32_1 = arith.constant 0 : i32
    return %c0_i32, %c0_i32_0 : i32, i32
  }
  func.func @transform_11(%arg0: i32) -> (i32, i32) {
    %c0_i32 = arith.constant 0 : i32
    %c0_i32_0 = arith.constant 0 : i32
    %c0_i32_1 = arith.constant 0 : i32
    return %c0_i32, %c0_i32_0 : i32, i32
  }
  func.func @transform_12(%arg0: i32) -> (i32, i32) {
    %c0_i32 = arith.constant 0 : i32
    %c0_i32_0 = arith.constant 0 : i32
    %c0_i32_1 = arith.constant 0 : i32
    return %c0_i32, %c0_i32_0 : i32, i32
  }
  func.func @transform_13(%arg0: i32) -> (i32, i32) {
    %c0_i32 = arith.constant 0 : i32
    %c0_i32_0 = arith.constant 0 : i32
    %c0_i32_1 = arith.constant 0 : i32
    return %c0_i32, %c0_i32_0 : i32, i32
  }
  func.func @transform_14(%arg0: i32) -> (i32, i32) {
    %c0_i32 = arith.constant 0 : i32
    %c0_i32_0 = arith.constant 0 : i32
    %c0_i32_1 = arith.constant 0 : i32
    return %c0_i32, %c0_i32_0 : i32, i32
  }
  func.func @transform_15(%arg0: i32) -> (i32, i32, i32) {
    %c0_i32 = arith.constant 0 : i32
    %c0_i32_0 = arith.constant 0 : i32
    %c0_i32_1 = arith.constant 0 : i32
    return %arg0, %c0_i32, %c0_i32_0 : i32, i32, i32
  }
  func.func @transform_16(%arg0: i32) -> (i32, i32, i32) {
    %c0_i32 = arith.constant 0 : i32
    %c0_i32_0 = arith.constant 0 : i32
    %c0_i32_1 = arith.constant 0 : i32
    return %arg0, %c0_i32, %c0_i32_0 : i32, i32, i32
  }
  func.func @transform_17(%arg0: i32) -> (i32, i32) {
    %c0_i32 = arith.constant 0 : i32
    %c0_i32_0 = arith.constant 0 : i32
    return %arg0, %c0_i32 : i32, i32
  }
}

</mosaic_0001>

<bundles_post_ra>
// kernel: transformer_layer.1
= control target key start
LH: loop header
LB: loop body
LE: loop exit
PB: predicated region body
PF: predicated region fallthrough
CT: control target
= control target key end

     0   :  { %s3039_s0 = inlined_call_operand.vmem [shape: f32[2,8,32], index: 0, kind: input, shape index: {}]   ;;  %s3040_s1 = inlined_call_operand.vmem [shape: f32[2,8,1], index: 1, kind: input, shape index: {}]   ;;  %s3041_s2 = inlined_call_operand.vmem [shape: f32[2,1,8], index: 2, kind: input, shape index: {}]   ;;  %s3042_s3 = inlined_call_operand.vmem [shape: f32[2,8,3], index: 3, kind: input, shape index: {}]   ;;  %s3043_s4 = inlined_call_operand.vmem [shape: f32[2,16], index: 4, kind: input, shape index: {}]   ;;  %s3044_s5 = inlined_call_operand.vmem [shape: bf16[32,96], index: 5, kind: input, shape index: {}]   ;;  %s3045_s6 = inlined_call_operand.vmem [shape: bf16[32,32], index: 6, kind: input, shape index: {}]   ;;  %s3046_s7 = inlined_call_operand.vmem [shape: bf16[32,64], index: 7, kind: input, shape index: {}]   ;;  %s3047_s8 = inlined_call_operand.vmem [shape: bf16[64,32], index: 8, kind: input, shape index: {}]   ;;  %s3048_s9 = inlined_call_operand.vmem [shape: f32[1,32], index: 9, kind: input, shape index: {}]   ;;  %s3049_s10 = inlined_call_operand.vmem [shape: f32[16,16], index: 10, kind: input, shape index: {}]   ;;  %s3050_s11 = inlined_call_operand.vmem [shape: f32[32,16], index: 11, kind: input, shape index: {}]   ;;  %s3051_s12 = inlined_call_operand.vmem [shape: f32[16,64], index: 12, kind: input, shape index: {}]   ;;  %s3052_s13 = inlined_call_operand.vmem [shape: f32[64,16], index: 13, kind: input, shape index: {}]   ;;  %s3053_s14 = inlined_call_operand.vmem [shape: f32[1,2048], index: 14, kind: input, shape index: {}]   ;;  %s3054_s15 = inlined_call_operand.hbm [shape: f32[2,8,32], index: 15, kind: output, shape index: {0}]   ;;  %s3055_s16 = inlined_call_operand.vmem [shape: f32[2,8,3], index: 16, kind: output, shape index: {1}]   ;;  %s3056_s17 = inlined_call_operand.hbm [shape: f32[2,16], index: 17, kind: output, shape index: {2}]  }
   0x1   :  { %3059 = sst [smem:[#allocation8_spill]] %s3039_s0 }
   0x2   :  { %3060 = sst [smem:[#allocation9_spill]] %s3040_s1 }
   0x3   :  { %23 = vsyncpa [#allocation3], 0  ;;  %v2317_v0 = vld [vmem:[%s3044_s5 + $0x8] sm:$0xff]   ;;  %v2427_v1 = vmov 0.0   ;;  %v2318_v2 = vld [vmem:[%s3044_s5] sm:$0xff]   ;;  %vm2428_vm0 = vmmov 0  }
   0x4   :  { %2110 = vmatprep.subr.bf16.mxu1 %v2427_v1  ;;  %2124 = vmatprep.subr.bf16.mxu0 %v2427_v1  ;;  %s3061_s0 = sld [smem:[#allocation8_spill]]  ;;  %vm105_vm1 = vcmask 261120  }
   0x5   :  { %2111 = vmatpush3.bf16.msra.mxu1 %v2317_v0  ;;  %2114 = vmatprep.mubr.msk.bf16.mxu1 %vm2428_vm0, %v2427_v1 }
   0x6   :  { %2112 = vmatprep.subr.bf16.mxu1 %v2427_v1  ;;  %2126 = vmatprep.mubr.msk.bf16.mxu0 %vm2428_vm0, %v2427_v1 }
   0x9   :  { %2113 = vmatpush3.bf16.msra.mxu1 %v2318_v2 }
   0xa   :  { %v2544_v3 = vld [vmem:[%s3061_s0] sm:$0xff]  ;;  %v2549_v4 = vld [vmem:[%s3061_s0 + $0x8] sm:$0xff]  ;;  %2118 = vmatprep.subr.bf16.mxu1 %v2427_v1 }
   0xb   :  { %v81_v5 = vpack.c.bf16 %v2549_v4, %v2544_v3 }
   0xc   :  { %24 = vsyncpa [#allocation5], 0  ;;  %v1991_v7 = vld [vmem:[%s3053_s14] ss:$0 sm:$0xff]  ;;  %s2429_s1 = smov 104   ;;  %s2430_s20 = smov 120  }
   0xd   :  { %2115 = vmatmul.mubr.msk.bf16.vlgmr.msra.gmra.mxu1 %vm105_vm1, %v81_v5  ;;  %s2431_s21 = smov 96   ;;  %s2432_s22 = smov 112   ;;  %vm195_vm2 = vcmask 64512   ;;  %vm686_vm3 = vcmask 1043456   ;;  %v1995_v51 = vld [vmem:[%s3041_s2] ss:$0 sm:$0xff] }
   0xe   :  { %2120 = vmatprep.mubr.msk.bf16.mxu1 %vm2428_vm0, %v2427_v1  ;;  %s2433_s23 = smov 64   ;;  %v1996_v55 = vld [vmem:[%s3041_s2 + $0x1] ss:$0 sm:$0xff]  ;;  %s2434_s2 = smov 8   ;;  %vm1092_vm4 = vcmask 130048   ;;  %vm1095_vm5 = vcmask 195584  }
   0xf   :  { %s2435_s28 = smov 16   ;;  %s2436_s30 = smov 24   ;;  %vm60_vm6 = vcmask 7168   ;;  %vm1648_vm7 = vcmask 1041409   ;;  %vm1436_vm8 = vcmask 523264   ;;  %vm1726_vm9 = vcmask 123904  }
  0x10   :  { %vm1208_vm10 = vcmask 23552  }
  0xcd   :  { %v143_v6 = vpop.f32.mrf.mxu1 }
  0xce   :  { %v144_v10 = vadd.f32 %v1991_v7, %v143_v6 }
  0xcf   :  { %v2116_v8 = vpop.f32.mrf.mxu1 }
  0xd0   :  { %v170_v14 = vpack.c.bf16 %v144_v10, %v144_v10 }
  0xd1   :  { %v146_v9 = vpop.f32.mrf.mxu1 }
  0xd2   :  { %v147_v11 = vadd.f32 %v1991_v7, %v146_v9 }
  0xd3   :  { %v2117_v12 = vpop.f32.mrf.mxu1 }
  0xd4   :  { %v2310_v13 = vpack.i.bf16 %v147_v11, %v144_v10  ;;  %v171_v15 = vpack.c.bf16 %v147_v11, %v147_v11 }
  0xd6   :  { %2311 = vrot.lane.b32.xlu1 %v2310_v13, %s2429_s1  ;;  %2301 = vrot.lane.b32.xlu0 %v2310_v13, %s2430_s20 }
  0xda   :  { %193 = vrot.lane.b32.xlu1 %v170_v14, %s2431_s21  ;;  %2306 = vrot.lane.b32.xlu0 %v2310_v13, %s2432_s22 }
  0xde   :  { %243 = vrot.lane.b32.xlu0 %v171_v15, %s2431_s21 }
 0x148   :  { %v2312_v16 = vpop.permute.xlu1 %2311  ;;  %v2302_v17 = vpop.permute.xlu0 %2301 }
 0x149   :  { %v2304_v18 = vunpack.i.h.bf16 %v2302_v17  ;;  %v2303_v19 = vunpack.i.l.bf16 %v2302_v17  ;;  %v2313_v27 = vunpack.i.l.bf16 %v2312_v16  ;;  %v2314_v30 = vunpack.i.h.bf16 %v2312_v16 }
 0x14b   :  { %v2565_v20 = vpack.c.bf16 %v2304_v18, %v2304_v18  ;;  %v2567_v21 = vpack.c.bf16 %v2303_v19, %v2303_v19  ;;  %v2584_v33 = vpack.c.bf16 %v2313_v27, %v2313_v27  ;;  %v2587_v34 = vpack.c.bf16 %v2314_v30, %v2314_v30 }
 0x14c   :  { %v194_v22 = vpop.permute.xlu1 %193  ;;  %v2307_v23 = vpop.permute.xlu0 %2306 }
 0x14d   :  { %v200_v24 = vsel %vm195_vm2, %v194_v22, 0  ;;  %v2309_v25 = vunpack.i.h.bf16 %v2307_v23  ;;  %v2308_v26 = vunpack.i.l.bf16 %v2307_v23  ;;  %292 = vrot.lane.b32.xlu1 %v2567_v21, %s2431_s21  ;;  %341 = vrot.lane.b32.xlu0 %v2565_v20, %s2431_s21 }
 0x14e   :  { %2119 = vmatpush3.bf16.xpose.msra.mxu1 %v200_v24 }
 0x14f   :  { %v2574_v28 = vpack.c.bf16 %v2309_v25, %v2309_v25  ;;  %v2576_v29 = vpack.c.bf16 %v2308_v26, %v2308_v26  ;;  %2130 = vmatprep.subr.bf16.mxu1 %v2427_v1 }
 0x150   :  { %v244_v31 = vpop.permute.xlu0 %243 }
 0x151   :  { %390 = vrot.lane.b32.xlu1 %v2576_v29, %s2431_s21  ;;  %439 = vrot.lane.b32.xlu0 %v2574_v28, %s2431_s21  ;;  %v249_v32 = vsel %vm195_vm2, %v244_v31, 0 }
 0x152   :  { %2125 = vmatpush3.bf16.xpose.msra.mxu0 %v249_v32 }
 0x153   :  { %2136 = vmatprep.subr.bf16.mxu0 %v2427_v1 }
 0x155   :  { %2121 = vmatmul.mubr.msk.bf16.vlgmr.msra.gmra.mxu1 %vm195_vm2, %v170_v14  ;;  %488 = vrot.lane.b32.xlu1 %v2584_v33, %s2431_s21 }
 0x156   :  { %537 = vrot.lane.b32.xlu0 %v2587_v34, %s2431_s21  ;;  %2132 = vmatprep.mubr.msk.bf16.mxu1 %vm2428_vm0, %v2427_v1  ;;  %s3062_s21 = sld [smem:[#allocation9_spill]] }
 0x159   :  { %730 = vrot.lane.b32.xlu1 %v171_v15, %s2433_s23  ;;  %2127 = vmatmul.mubr.msk.bf16.vlgmr.msra.gmra.mxu0 %vm195_vm2, %v171_v15 }
 0x15a   :  { %681 = vrot.lane.b32.xlu0 %v170_v14, %s2433_s23  ;;  %2138 = vmatprep.mubr.msk.bf16.mxu0 %vm2428_vm0, %v2427_v1 }
 0x1bf   :  { %v293_v35 = vpop.permute.xlu1 %292  ;;  %v342_v36 = vpop.permute.xlu0 %341 }
 0x1c0   :  { %v298_v37 = vsel %vm195_vm2, %v293_v35, 0  ;;  %v347_v38 = vsel %vm195_vm2, %v342_v36, 0 }
 0x1c1   :  { %2131 = vmatpush3.bf16.xpose.msra.mxu1 %v298_v37  ;;  %2137 = vmatpush3.bf16.xpose.msra.mxu0 %v347_v38 }
 0x1c2   :  { %2142 = vmatprep.subr.bf16.mxu1 %v2427_v1  ;;  %2148 = vmatprep.subr.bf16.mxu0 %v2427_v1 }
 0x1c3   :  { %v391_v39 = vpop.permute.xlu1 %390  ;;  %v440_v40 = vpop.permute.xlu0 %439 }
 0x1c4   :  { %v396_v41 = vsel %vm195_vm2, %v391_v39, 0  ;;  %v445_v42 = vsel %vm195_vm2, %v440_v40, 0 }
 0x1c7   :  { %v489_v43 = vpop.permute.xlu1 %488 }
 0x1c8   :  { %2133 = vmatmul.mubr.msk.bf16.vlgmr.msra.gmra.mxu1 %vm195_vm2, %v2567_v21  ;;  %2139 = vmatmul.mubr.msk.bf16.vlgmr.msra.gmra.mxu0 %vm195_vm2, %v2565_v20  ;;  %v538_v44 = vpop.permute.xlu0 %537  ;;  %v494_v45 = vsel %vm195_vm2, %v489_v43, 0 }
 0x1c9   :  { %2143 = vmatpush3.bf16.xpose.msra.mxu1 %v396_v41  ;;  %2149 = vmatpush3.bf16.xpose.msra.mxu0 %v445_v42  ;;  %v543_v46 = vsel %vm195_vm2, %v538_v44, 0 }
 0x1ca   :  { %2144 = vmatprep.mubr.msk.bf16.mxu1 %vm2428_vm0, %v2427_v1  ;;  %2150 = vmatprep.mubr.msk.bf16.mxu0 %vm2428_vm0, %v2427_v1 }
 0x1cb   :  { %2154 = vmatprep.subr.bf16.mxu1 %v2427_v1  ;;  %2160 = vmatprep.subr.bf16.mxu0 %v2427_v1  ;;  %v731_v47 = vpop.permute.xlu1 %730 }
 0x1cc   :  { %v682_v48 = vpop.permute.xlu0 %681  ;;  %v736_v49 = vsel %vm686_vm3, %v731_v47, 0 }
 0x1cd   :  { %v688_v50 = vsel %vm686_vm3, %v682_v48, 0 }
 0x1d0   :  { %2145 = vmatmul.mubr.msk.bf16.vlgmr.msra.gmra.mxu1 %vm195_vm2, %v2576_v29  ;;  %2151 = vmatmul.mubr.msk.bf16.vlgmr.msra.gmra.mxu0 %vm195_vm2, %v2574_v28 }
 0x1d1   :  { %2155 = vmatpush3.bf16.xpose.msra.mxu1 %v494_v45  ;;  %2161 = vmatpush3.bf16.xpose.msra.mxu0 %v543_v46 }
 0x1d2   :  { %2156 = vmatprep.mubr.msk.bf16.mxu1 %vm2428_vm0, %v2427_v1  ;;  %2162 = vmatprep.mubr.msk.bf16.mxu0 %vm2428_vm0, %v2427_v1 }
 0x1d3   :  { %2166 = vmatprep.subr.bf16.mxu1 %v2427_v1  ;;  %2172 = vmatprep.subr.bf16.mxu0 %v2427_v1 }
 0x1d8   :  { %2157 = vmatmul.mubr.msk.bf16.vlgmr.msra.gmra.mxu1 %vm195_vm2, %v2584_v33  ;;  %2163 = vmatmul.mubr.msk.bf16.vlgmr.msra.gmra.mxu0 %vm195_vm2, %v2587_v34 }
 0x1d9   :  { %2167 = vmatpush3.bf16.msra.mxu1 %v688_v50  ;;  %2173 = vmatpush3.bf16.msra.mxu0 %v736_v49 }
 0x1da   :  { %2168 = vmatprep.mubr.msk.bf16.mxu1 %vm2428_vm0, %v2427_v1  ;;  %2174 = vmatprep.mubr.msk.bf16.mxu0 %vm2428_vm0, %v2427_v1 }
 0x1db   :  { %2178 = vmatprep.subr.bf16.mxu1 %v2427_v1  ;;  %2184 = vmatprep.subr.bf16.mxu0 %v2427_v1 }
 0x215   :  { %v236_v52 = vpop.f32.mrf.mxu1 }
 0x216   :  { %v237_v53 = vadd.f32 %v1995_v51, %v236_v52 }
 0x217   :  { %v2122_v54 = vpop.f32.mrf.mxu1 }
 0x218   :  { %v585_v56 = vsel %vm195_vm2, %v237_v53, -inf }
 0x219   :  { %v285_v57 = vpop.f32.mrf.mxu0  ;;  %586 = vmax.xlane.f32.xlu1 %v585_v56  ;;  %v239_v58 = vpop.f32.mrf.mxu1 }
 0x21a   :  { %v286_v59 = vadd.f32 %v1996_v55, %v285_v57 }
 0x21b   :  { %v2123_v60 = vpop.f32.mrf.mxu1  ;;  %v2128_v61 = vpop.f32.mrf.mxu0 }
 0x21c   :  { %v588_v62 = vsel %vm195_vm2, %v286_v59, -inf }
 0x21d   :  { %589 = vmax.xlane.f32.xlu0 %v588_v62  ;;  %v288_v63 = vpop.f32.mrf.mxu0 }
 0x21f   :  { %v2129_v0 = vpop.f32.mrf.mxu0 }
 0x288   :  { %v334_v2 = vpop.f32.mrf.mxu1  ;;  %v383_v5 = vpop.f32.mrf.mxu0 }
 0x289   :  { %v335_v6 = vadd.f32 %v1995_v51, %v334_v2  ;;  %v384_v7 = vadd.f32 %v1996_v55, %v383_v5 }
 0x28a   :  { %v2134_v8 = vpop.f32.mrf.mxu1  ;;  %v2140_v9 = vpop.f32.mrf.mxu0 }
 0x28b   :  { %v594_v10 = vsel %vm195_vm2, %v384_v7, -inf  ;;  %v591_v11 = vsel %vm195_vm2, %v335_v6, -inf }
 0x28c   :  { %v386_v12 = vpop.f32.mrf.mxu0  ;;  %595 = vmax.xlane.f32.xlu1 %v594_v10  ;;  %592 = vmax.xlane.f32.xlu0 %v591_v11  ;;  %v337_v13 = vpop.f32.mrf.mxu1 }
 0x28e   :  { %v2135_v14 = vpop.f32.mrf.mxu1  ;;  %v2141_v15 = vpop.f32.mrf.mxu0 }
 0x290   :  { %v432_v16 = vpop.f32.mrf.mxu1  ;;  %v481_v17 = vpop.f32.mrf.mxu0 }
 0x291   :  { %v2651_v18 = vadd.f32 %v1995_v51, %v432_v16  ;;  %v482_v19 = vadd.f32 %v1996_v55, %v481_v17 }
 0x292   :  { %v2146_v22 = vpop.f32.mrf.mxu1  ;;  %v2152_v23 = vpop.f32.mrf.mxu0 }
 0x293   :  { %v600_v24 = vsel %vm195_vm2, %v482_v19, -inf  ;;  %v597_v25 = vsel %vm195_vm2, %v2651_v18, -inf }
 0x294   :  { %v484_v26 = vpop.f32.mrf.mxu0  ;;  %601 = vmax.xlane.f32.xlu1 %v600_v24  ;;  %598 = vmax.xlane.f32.xlu0 %v597_v25  ;;  %v435_v27 = vpop.f32.mrf.mxu1 }
 0x296   :  { %v2147_v30 = vpop.f32.mrf.mxu1  ;;  %v2153_v31 = vpop.f32.mrf.mxu0 }
 0x298   :  { %v530_v32 = vpop.f32.mrf.mxu1  ;;  %v579_v35 = vpop.f32.mrf.mxu0 }
 0x299   :  { %v2656_v36 = vadd.f32 %v1995_v51, %v530_v32  ;;  %v580_v37 = vadd.f32 %v1996_v55, %v579_v35 }
 0x29a   :  { %v2158_v38 = vpop.f32.mrf.mxu1  ;;  %v2164_v39 = vpop.f32.mrf.mxu0 }
 0x29b   :  { %v606_v40 = vsel %vm195_vm2, %v580_v37, -inf  ;;  %v603_v41 = vsel %vm195_vm2, %v2656_v36, -inf }
 0x29c   :  { %v582_v42 = vpop.f32.mrf.mxu0  ;;  %607 = vmax.xlane.f32.xlu1 %v606_v40  ;;  %604 = vmax.xlane.f32.xlu0 %v603_v41  ;;  %v533_v43 = vpop.f32.mrf.mxu1 }
 0x29e   :  { %v2159_v44 = vpop.f32.mrf.mxu1  ;;  %v2165_v45 = vpop.f32.mrf.mxu0 }
 0x2a2   :  { %v587_v46 = vpop.xlane.xlu1 %586 }
 0x2a3   :  { %v609_v48 = vsub.f32 %v237_v53, %v587_v46 }
 0x2a5   :  { %v617_v50 = vmul.f32 1.442695, %v609_v48 }
 0x2a6   :  { %v590_v47 = vpop.xlane.xlu0 %589 }
 0x2a7   :  { %v610_v49 = vsub.f32 %v286_v59, %v590_v47  ;;  %2327 = vpow2.f32 %v617_v50 }
 0x2a9   :  { %v619_v51 = vmul.f32 1.442695, %v610_v49 }
 0x2ab   :  { %2329 = vpow2.f32 %v619_v51 }
 0x2ad   :  { %778 = vrot.lane.b32.xlu1 %v2567_v21, %s2433_s23 }
 0x2b2   :  { %826 = vrot.lane.b32.xlu0 %v2565_v20, %s2433_s23 }
 0x2b4   :  { %v2328_v52 = vpop.eup %2327 }
 0x2b5   :  { %v633_v56 = vsel %vm195_vm2, %v2328_v52, 0.0 }
 0x2b8   :  { %v2330_v54 = vpop.eup %2329 }
 0x2b9   :  { %v636_v55 = vsel %vm195_vm2, %v2330_v54, 0.0 }
 0x2d1   :  { %637 = vadd.xlane.f32.xlu1 %v636_v55  ;;  %634 = vadd.xlane.f32.xlu0 %v633_v56 }
 0x2e2   :  { %874 = vrot.lane.b32.xlu1 %v2576_v29, %s2433_s23 }
 0x315   :  { %v596_v20 = vpop.xlane.xlu1 %595  ;;  %v593_v21 = vpop.xlane.xlu0 %592 }
 0x316   :  { %v612_v57 = vsub.f32 %v384_v7, %v596_v20  ;;  %v611_v53 = vsub.f32 %v335_v6, %v593_v21 }
 0x318   :  { %v623_v58 = vmul.f32 1.442695, %v612_v57  ;;  %v621_v59 = vmul.f32 1.442695, %v611_v53 }
 0x31a   :  { %2331 = vpow2.f32 %v623_v58 }
 0x31b   :  { %2333 = vpow2.f32 %v621_v59 }
 0x31d   :  { %v602_v60 = vpop.xlane.xlu1 %601  ;;  %v599_v12 = vpop.xlane.xlu0 %598 }
 0x31e   :  { %v614_v61 = vsub.f32 %v482_v19, %v602_v60  ;;  %v613_v13 = vsub.f32 %v2651_v18, %v599_v12 }
 0x320   :  { %v627_v62 = vmul.f32 1.442695, %v614_v61  ;;  %v625_v15 = vmul.f32 1.442695, %v613_v13 }
 0x322   :  { %2335 = vpow2.f32 %v627_v62 }
 0x325   :  { %v608_v63 = vpop.xlane.xlu1 %607  ;;  %v605_v14 = vpop.xlane.xlu0 %604 }
 0x326   :  { %v616_v0 = vsub.f32 %v580_v37, %v608_v63  ;;  %v615_v16 = vsub.f32 %v2656_v36, %v605_v14 }
 0x327   :  { %v2332_v2 = vpop.eup %2331 }
 0x328   :  { %v2669_v5 = vpop.eup %2333  ;;  %v631_v8 = vmul.f32 1.442695, %v616_v0  ;;  %v642_v29 = vsel %vm195_vm2, %v2332_v2, 0.0  ;;  %v629_v17 = vmul.f32 1.442695, %v615_v16 }
 0x329   :  { %643 = vadd.xlane.f32.xlu1 %v642_v29  ;;  %v639_v6 = vsel %vm195_vm2, %v2669_v5, 0.0  ;;  %v779_v19 = vpop.permute.xlu1 %778  ;;  %v827_v22 = vpop.permute.xlu0 %826 }
 0x32a   :  { %2337 = vpow2.f32 %v631_v8  ;;  %640 = vadd.xlane.f32.xlu0 %v639_v6  ;;  %v832_v36 = vsel %vm686_vm3, %v827_v22, 0  ;;  %v784_v37 = vsel %vm686_vm3, %v779_v19, 0 }
 0x32b   :  { %2339 = vpow2.f32 %v625_v15 }
 0x32c   :  { %2341 = vpow2.f32 %v629_v17 }
 0x32f   :  { %v2674_v7 = vpop.eup %2335 }
 0x330   :  { %v648_v9 = vsel %vm195_vm2, %v2674_v7, 0.0 }
 0x331   :  { %649 = vadd.xlane.f32.xlu1 %v648_v9 }
 0x337   :  { %v2678_v10 = vpop.eup %2337 }
 0x338   :  { %v654_v11 = vsel %vm195_vm2, %v2678_v10, 0.0  ;;  %v2688_v25 = vpop.eup %2339 }
 0x339   :  { %655 = vadd.xlane.f32.xlu1 %v654_v11  ;;  %v2692_v18 = vpop.eup %2341 }
 0x340   :  { %922 = vrot.lane.b32.xlu0 %v2574_v28, %s2433_s23  ;;  %v645_v28 = vsel %vm195_vm2, %v2688_v25, 0.0 }
 0x34a   :  { %970 = vrot.lane.b32.xlu1 %v2584_v33, %s2433_s23  ;;  %v651_v33 = vsel %vm195_vm2, %v2692_v18, 0.0 }
 0x35a   :  { %v638_v23 = vpop.xlane.xlu1 %637  ;;  %v635_v24 = vpop.xlane.xlu0 %634 }
 0x35b   :  { %2343 = vrcp.f32 %v638_v23 }
 0x35c   :  { %2345 = vrcp.f32 %v635_v24 }
 0x35e   :  { %v875_v38 = vpop.permute.xlu1 %874 }
 0x35f   :  { %646 = vadd.xlane.f32.xlu0 %v645_v28 }
 0x363   :  { %652 = vadd.xlane.f32.xlu0 %v651_v33  ;;  %v2319_v33 = vld [vmem:[%s3045_s6 + $0x8] sm:$0xff]  }
 0x368   :  { %v2344_v26 = vpop.eup %2343 }
 0x369   :  { %v2346_v27 = vpop.eup %2345  ;;  %v666_v30 = vmul.f32 %v2344_v26, %v2330_v54 }
 0x36a   :  { %v665_v31 = vmul.f32 %v2346_v27, %v2328_v52  ;;  %v2320_v27 = vld [vmem:[%s3045_s6] sm:$0xff]  }
 0x36b   :  { %v674_v32 = vpack.c.bf16 %v666_v30, %v666_v30 }
 0x36c   :  { %v673_v35 = vpack.c.bf16 %v665_v31, %v665_v31 }
 0x36d   :  { %2175 = vmatmul.mubr.msk.bf16.vlgmr.msra.gmra.mxu0 %vm195_vm2, %v674_v32 }
 0x36e   :  { %2169 = vmatmul.mubr.msk.bf16.vlgmr.msra.gmra.mxu1 %vm195_vm2, %v673_v35  ;;  %2185 = vmatpush3.bf16.msra.mxu0 %v832_v36 }
 0x36f   :  { %2179 = vmatpush3.bf16.msra.mxu1 %v784_v37  ;;  %2180 = vmatprep.mubr.msk.bf16.mxu1 %vm2428_vm0, %v2427_v1 }
 0x370   :  { %2186 = vmatprep.mubr.msk.bf16.mxu0 %vm2428_vm0, %v2427_v1  ;;  %2190 = vmatprep.subr.bf16.mxu1 %v2427_v1 }
 0x371   :  { %2196 = vmatprep.subr.bf16.mxu0 %v2427_v1 }
 0x379   :  { %1018 = vrot.lane.b32.xlu0 %v2587_v34, %s2433_s23  ;;  %v880_v34 = vsel %vm686_vm3, %v875_v38, 0 }
 0x3b2   :  { %v644_v39 = vpop.xlane.xlu1 %643 }
 0x3b3   :  { %2347 = vrcp.f32 %v644_v39  ;;  %v641_v40 = vpop.xlane.xlu0 %640 }
 0x3b4   :  { %2349 = vrcp.f32 %v641_v40 }
 0x3b7   :  { %v923_v45 = vpop.permute.xlu0 %922 }
 0x3b8   :  { %v928_v49 = vsel %vm686_vm3, %v923_v45, 0 }
 0x3ba   :  { %v650_v41 = vpop.xlane.xlu1 %649 }
 0x3bb   :  { %2351 = vrcp.f32 %v650_v41 }
 0x3c0   :  { %v2348_v42 = vpop.eup %2347 }
 0x3c1   :  { %v2350_v43 = vpop.eup %2349  ;;  %v668_v44 = vmul.f32 %v2348_v42, %v2332_v2 }
 0x3c2   :  { %v667_v46 = vmul.f32 %v2350_v43, %v2669_v5  ;;  %v656_v54 = vpop.xlane.xlu1 %655 }
 0x3c3   :  { %v676_v47 = vpack.c.bf16 %v668_v44, %v668_v44  ;;  %2353 = vrcp.f32 %v656_v54 }
 0x3c4   :  { %v675_v48 = vpack.c.bf16 %v667_v46, %v667_v46 }
 0x3c5   :  { %2187 = vmatmul.mubr.msk.bf16.vlgmr.msra.gmra.mxu0 %vm195_vm2, %v676_v47 }
 0x3c6   :  { %2181 = vmatmul.mubr.msk.bf16.vlgmr.msra.gmra.mxu1 %vm195_vm2, %v675_v48  ;;  %2197 = vmatpush3.bf16.msra.mxu0 %v928_v49  ;;  %v971_v61 = vpop.permute.xlu1 %970 }
 0x3c7   :  { %2191 = vmatpush3.bf16.msra.mxu1 %v880_v34  ;;  %2198 = vmatprep.mubr.msk.bf16.mxu0 %vm2428_vm0, %v2427_v1  ;;  %v976_v0 = vsel %vm686_vm3, %v971_v61, 0 }
 0x3c8   :  { %v2352_v50 = vpop.eup %2351  ;;  %2208 = vmatprep.subr.bf16.mxu0 %v2427_v1  ;;  %2192 = vmatprep.mubr.msk.bf16.mxu1 %vm2428_vm0, %v2427_v1 }
 0x3c9   :  { %v670_v51 = vmul.f32 %v2352_v50, %v2674_v7  ;;  %2202 = vmatprep.subr.bf16.mxu1 %v2427_v1 }
 0x3cb   :  { %v678_v52 = vpack.c.bf16 %v670_v51, %v670_v51 }
 0x3cd   :  { %2199 = vmatmul.mubr.msk.bf16.vlgmr.msra.gmra.mxu0 %vm195_vm2, %v678_v52 }
 0x3ce   :  { %2210 = vmatprep.mubr.msk.bf16.mxu0 %vm2428_vm0, %v2427_v1 }
 0x3d0   :  { %v2354_v56 = vpop.eup %2353 }
 0x3d1   :  { %v672_v21 = vmul.f32 %v2354_v56, %v2678_v10  ;;  %v2013_v56 = vld [vmem:[%s3053_s14 + $0x1] ss:$0 sm:$0xff] }
 0x3d3   :  { %v680_v58 = vpack.c.bf16 %v672_v21, %v672_v21 }
 0x3e8   :  { %v647_v55 = vpop.xlane.xlu0 %646 }
 0x3e9   :  { %2355 = vrcp.f32 %v647_v55 }
 0x3ec   :  { %v653_v20 = vpop.xlane.xlu0 %652 }
 0x3ed   :  { %2357 = vrcp.f32 %v653_v20 }
 0x3f0   :  { %v1019_v57 = vpop.permute.xlu0 %1018 }
 0x3f1   :  { %v1024_v53 = vsel %vm686_vm3, %v1019_v57, 0 }
 0x3f2   :  { %2209 = vmatpush3.bf16.msra.mxu0 %v1024_v53 }
 0x3f3   :  { %2222 = vmatprep.subr.bf16.mxu0 %v2427_v1 }
 0x3f5   :  { %2211 = vmatmul.mubr.msk.bf16.vlgmr.msra.gmra.mxu0 %vm195_vm2, %v680_v58 }
 0x3f6   :  { %v2356_v59 = vpop.eup %2355  ;;  %2226 = vmatprep.mubr.msk.bf16.mxu0 %vm2428_vm0, %v2427_v1 }
 0x3f7   :  { %v669_v60 = vmul.f32 %v2356_v59, %v2688_v25 }
 0x3f9   :  { %v677_v62 = vpack.c.bf16 %v669_v60, %v669_v60 }
 0x3fa   :  { %v2358_v63 = vpop.eup %2357 }
 0x3fb   :  { %2193 = vmatmul.mubr.msk.bf16.vlgmr.msra.gmra.mxu1 %vm195_vm2, %v677_v62  ;;  %v671_v2 = vmul.f32 %v2358_v63, %v2692_v18 }
 0x3fc   :  { %2203 = vmatpush3.bf16.msra.mxu1 %v976_v0  ;;  %2204 = vmatprep.mubr.msk.bf16.mxu1 %vm2428_vm0, %v2427_v1  ;;  %v2437_v0 = vmov 0  }
 0x3fd   :  { %2214 = vmatprep.subr.bf16.mxu1 %v2427_v1  ;;  %v679_v5 = vpack.c.bf16 %v671_v2, %v671_v2  ;;  %2316 = vset.pattern.permute.xlu1 %v2437_v0 }
 0x3fe   :  { %2315 = vset.pattern.permute.xlu0 %v2437_v0 }
 0x403   :  { %2205 = vmatmul.mubr.msk.bf16.vlgmr.msra.gmra.mxu1 %vm195_vm2, %v679_v5  ;;  %v2785_v5 = vld [vmem:[%s3062_s21 + $0x8] sm:$0xff] }
 0x404   :  { %2218 = vmatprep.mubr.msk.bf16.mxu1 %vm2428_vm0, %v2427_v1  ;;  %2215 = vmatpush3.bf16.msra.mxu1 %v2319_v33 }
 0x405   :  { %2216 = vmatprep.subr.bf16.mxu1 %v2427_v1 }
 0x408   :  { %2217 = vmatpush3.bf16.msra.mxu1 %v2320_v27 }
 0x409   :  { %2230 = vmatprep.subr.bf16.mxu1 %v2427_v1 }
 0x42d   :  { %v772_v8 = vpop.f32.mrf.mxu0 }
 0x42e   :  { %v724_v29 = vpop.f32.mrf.mxu1 }
 0x42f   :  { %v2176_v6 = vpop.f32.mrf.mxu0 }
 0x430   :  { %v2170_v7 = vpop.f32.mrf.mxu1 }
 0x431   :  { %v775_v9 = vpop.f32.mrf.mxu0 }
 0x432   :  { %v727_v10 = vpop.f32.mrf.mxu1 }
 0x433   :  { %v2177_v11 = vpop.f32.mrf.mxu0 }
 0x434   :  { %v2171_v12 = vpop.f32.mrf.mxu1 }
 0x485   :  { %v868_v13 = vpop.f32.mrf.mxu0 }
 0x486   :  { %v820_v14 = vpop.f32.mrf.mxu1  ;;  %1070 = vrot.lane.b32.xlu0 %v868_v13, %s2434_s2 }
 0x487   :  { %1068 = vrot.lane.b32.xlu1 %v820_v14, %s2434_s2  ;;  %v2188_v15 = vpop.f32.mrf.mxu0 }
 0x488   :  { %v2182_v16 = vpop.f32.mrf.mxu1 }
 0x489   :  { %v871_v17 = vpop.f32.mrf.mxu0 }
 0x48a   :  { %v823_v19 = vpop.f32.mrf.mxu1 }
 0x48b   :  { %v2189_v22 = vpop.f32.mrf.mxu0 }
 0x48c   :  { %v2183_v23 = vpop.f32.mrf.mxu1 }
 0x48d   :  { %v964_v24 = vpop.f32.mrf.mxu0 }
 0x48e   :  { %1078 = vrot.lane.b32.xlu0 %v964_v24, %s2435_s28 }
 0x48f   :  { %v2200_v25 = vpop.f32.mrf.mxu0 }
 0x491   :  { %v967_v28 = vpop.f32.mrf.mxu0 }
 0x493   :  { %v2201_v18 = vpop.f32.mrf.mxu0 }
 0x4b5   :  { %v1060_v26 = vpop.f32.mrf.mxu0 }
 0x4b6   :  { %1086 = vrot.lane.b32.xlu0 %v1060_v26, %s2436_s30 }
 0x4b7   :  { %v2212_v30 = vpop.f32.mrf.mxu0 }
 0x4b9   :  { %v1063_v31 = vpop.f32.mrf.mxu0 }
 0x4bb   :  { %v916_v32 = vpop.f32.mrf.mxu1  ;;  %v2213_v35 = vpop.f32.mrf.mxu0 }
 0x4bc   :  { %1076 = vrot.lane.b32.xlu1 %v916_v32, %s2435_s28  ;;  %v2321_v35 = vld [vmem:[%s3046_s7 + $0x8] sm:$0xff]  }
 0x4bd   :  { %v2194_v36 = vpop.f32.mrf.mxu1  ;;  %2223 = vmatpush3.bf16.msra.mxu0 %v2321_v35 }
 0x4be   :  { %2224 = vmatprep.subr.bf16.mxu0 %v2427_v1  ;;  %v2322_v36 = vld [vmem:[%s3046_s7] sm:$0xff]  }
 0x4bf   :  { %v919_v37 = vpop.f32.mrf.mxu1 }
 0x4c0   :  { %v2323_v37 = vld [vmem:[%s3047_s8 + $0x18] sm:$0xff]  }
 0x4c1   :  { %v2195_v38 = vpop.f32.mrf.mxu1  ;;  %2225 = vmatpush3.bf16.msra.mxu0 %v2322_v36 }
 0x4c2   :  { %2242 = vmatprep.subr.mxu0 %v2427_v1 }
 0x4c3   :  { %v1012_v39 = vpop.f32.mrf.mxu1 }
 0x4c4   :  { %1084 = vrot.lane.b32.xlu1 %v1012_v39, %s2436_s30 }
 0x4c5   :  { %v2206_v40 = vpop.f32.mrf.mxu1 }
 0x4c7   :  { %v1015_v41 = vpop.f32.mrf.mxu1 }
 0x4c9   :  { %v2207_v42 = vpop.f32.mrf.mxu1 }
 0x4f8   :  { %v1071_v43 = vpop.permute.xlu0 %1070 }
 0x4f9   :  { %v1069_v44 = vpop.permute.xlu1 %1068  ;;  %v1091_v48 = vsel %vm195_vm2, %v772_v8, %v1071_v43  ;;  %v68_v8 = vsel %vm60_vm6, %v2785_v5, 0.0 }
 0x4fa   :  { %v1090_v49 = vsel %vm195_vm2, %v724_v29, %v1069_v44  ;;  %v69_v6 = vrot.slane %v68_v8, 4 }
 0x4fc   :  { %v70_v9 = vadd.f32 %v69_v6, %v68_v8  ;;  %v1560_v6 = vld [vmem:[%s3049_s10] sm:$0xff] }
 0x4fe   :  { %v71_v13 = vrot.slane %v70_v9, 2 }
 0x500   :  { %v1079_v45 = vpop.permute.xlu0 %1078  ;;  %v72_v22 = vadd.f32 %v71_v13, %v70_v9 }
 0x501   :  { %v1094_v34 = vsel %vm1092_vm4, %v1091_v48, %v1079_v45 }
 0x502   :  { %v73_v18 = vrot.slane %v72_v22, 1 }
 0x504   :  { %v74_v27 = vadd.f32 %v73_v18, %v72_v22  ;;  %v2326_v18 = vld [vmem:[%s3047_s8] sm:$0xff]  }
 0x506   :  { %v76_v30 = vadd.f32 1e-09, %v74_v27 }
 0x528   :  { %v1087_v47 = vpop.permute.xlu0 %1086 }
 0x529   :  { %v2753_v52 = vsel %vm1095_vm5, %v1094_v34, %v1087_v47 }
 0x52e   :  { %v1077_v46 = vpop.permute.xlu1 %1076 }
 0x52f   :  { %v1093_v50 = vsel %vm1092_vm4, %v1090_v49, %v1077_v46 }
 0x536   :  { %v1085_v51 = vpop.permute.xlu1 %1084 }
 0x537   :  { %v2755_v54 = vsel %vm1095_vm5, %v1093_v50, %v1085_v51 }
 0x538   :  { %v1098_v55 = vpack.c.bf16 %v2753_v52, %v2755_v54 }
 0x53a   :  { %2219 = vmatmul.mubr.msk.bf16.vlgmr.msra.gmra.mxu1 %vm105_vm1, %v1098_v55 }
 0x53b   :  { %2238 = vmatprep.mubr.msk.bf16.mxu1 %vm2428_vm0, %v2427_v1  ;;  %2231 = vmatpush3.bf16.msra.mxu1 %v2323_v37 }
 0x53c   :  { %2232 = vmatprep.subr.bf16.mxu1 %v2427_v1 }
 0x5fa   :  { %v1159_v20 = vpop.f32.mrf.mxu1 }
 0x5fb   :  { %v2765_v21 = vadd.f32 %v2013_v56, %v1159_v20 }
 0x5fc   :  { %v2220_v57 = vpop.f32.mrf.mxu1 }
 0x5fd   :  { %v1279_v53 = vadd.f32 %v2765_v21, %v2544_v3  ;;  %v2778_v3 = vld [vmem:[%s3062_s21] sm:$0xff] }
 0x5fe   :  { %v1162_v58 = vpop.f32.mrf.mxu1  ;;  %v61_v2 = vsel %vm60_vm6, %v2778_v3, 0.0 }
 0x5ff   :  { %v2769_v59 = vadd.f32 %v2013_v56, %v1162_v58  ;;  %v1283_v60 = vsel %vm105_vm1, %v1279_v53, 0.0  ;;  %v2019_v56 = vld [vmem:[%s3053_s14 + $0x5] ss:$0 sm:$0xff] }
 0x600   :  { %1284 = vadd.xlane.f32.xlu1 %v1283_v60  ;;  %v2221_v61 = vpop.f32.mrf.mxu1 }
 0x601   :  { %v1280_v62 = vadd.f32 %v2769_v59, %v2549_v4  ;;  %v62_v4 = vrot.slane %v61_v2, 4 }
 0x603   :  { %v1286_v63 = vsel %vm105_vm1, %v1280_v62, 0.0  ;;  %v63_v29 = vadd.f32 %v62_v4, %v61_v2  ;;  %v1561_v4 = vld [vmem:[%s3049_s10 + $0x8] sm:$0xff] }
 0x604   :  { %1287 = vadd.xlane.f32.xlu0 %v1286_v63 }
 0x605   :  { %v64_v7 = vrot.slane %v63_v29, 2 }
 0x607   :  { %v65_v12 = vadd.f32 %v64_v7, %v63_v29 }
 0x609   :  { %v66_v19 = vrot.slane %v65_v12, 1 }
 0x60b   :  { %v67_v28 = vadd.f32 %v66_v19, %v65_v12  ;;  %v1645_v12 = vld [vmem:[%s3050_s11 + $0x18] sm:$0xff] }
 0x60d   :  { %v75_v26 = vadd.f32 1e-09, %v67_v28  ;;  %v2325_v28 = vld [vmem:[%s3047_s8 + $0x8] sm:$0xff]  }
 0x60f   :  { %2359 = vrcp.f32 %v75_v26 }
 0x610   :  { %2361 = vrcp.f32 %v76_v30 }
 0x61c   :  { %v2792_v31 = vpop.eup %2359 }
 0x61d   :  { %v2796_v32 = vpop.eup %2361 }
 0x689   :  { %v1285_v10 = vpop.xlane.xlu1 %1284 }
 0x68a   :  { %v1290_v11 = vmul.f32 0.03125, %v1285_v10 }
 0x68c   :  { %v1292_v14 = vsub.f32 %v1279_v53, %v1290_v11  ;;  %v1559_v11 = vld [vmem:[%s3043_s4] sm:$0x3] }
 0x68d   :  { %v1288_v15 = vpop.xlane.xlu0 %1287 }
 0x68e   :  { %v1291_v16 = vmul.f32 0.03125, %v1288_v15  ;;  %v1294_v17 = vmul.f32 %v1292_v14, %v1292_v14 }
 0x690   :  { %v1293_v23 = vsub.f32 %v1280_v62, %v1291_v16  ;;  %v1296_v24 = vsel %vm105_vm1, %v1294_v17, 0.0  ;;  %v1644_v16 = vld [vmem:[%s3050_s11 + $0x10] sm:$0xff]  ;;  %v1643_v17 = vld [vmem:[%s3050_s11 + $0x8] sm:$0xff] }
 0x691   :  { %1297 = vadd.xlane.f32.xlu0 %v1296_v24 }
 0x692   :  { %v1295_v25 = vmul.f32 %v1293_v23, %v1293_v23 }
 0x694   :  { %v1299_v33 = vsel %vm105_vm1, %v1295_v25, 0.0  ;;  %v2324_v25 = vld [vmem:[%s3047_s8 + $0x10] sm:$0xff]  }
 0x695   :  { %1300 = vadd.xlane.f32.xlu1 %v1299_v33  ;;  %2233 = vmatpush3.bf16.msra.mxu1 %v2324_v25  ;;  %v2021_v33 = vld [vmem:[%s3053_s14 + $0x3] ss:$0 sm:$0xff] }
 0x696   :  { %2234 = vmatprep.subr.bf16.mxu1 %v2427_v1 }
 0x699   :  { %2235 = vmatpush3.bf16.msra.mxu1 %v2325_v28 }
 0x69a   :  { %2236 = vmatprep.subr.bf16.mxu1 %v2427_v1 }
 0x69d   :  { %2237 = vmatpush3.bf16.msra.mxu1 %v2326_v18 }
 0x69e   :  { %2260 = vmatprep.subr.mxu1 %v2427_v1 }
 0x6a6   :  { %1272 = vperm.xlu1 %2316, %v2785_v5  }
 0x6a7   :  { %1267 = vperm.xlu0 %2315, %v2778_v3  }
 0x6aa   :  { %1549 = vperm.xlu1 %2316, %v2792_v31  }
 0x6ae   :  { %1554 = vperm.xlu1 %2316, %v2796_v32  }
 0x71a   :  { %v1298_v38 = vpop.xlane.xlu0 %1297 }
 0x71b   :  { %v1302_v39 = vmul.f32 0.03125, %v1298_v38 }
 0x71d   :  { %v1304_v40 = vadd.f32 1e-05, %v1302_v39 }
 0x71e   :  { %v1301_v41 = vpop.xlane.xlu1 %1300 }
 0x71f   :  { %2363 = vrsqrt.f32 %v1304_v40  ;;  %v1303_v42 = vmul.f32 0.03125, %v1301_v41 }
 0x721   :  { %v1305_v43 = vadd.f32 1e-05, %v1303_v42 }
 0x722   :  { %v2811_v44 = vpop.permute.xlu1 %1272  ;;  %v2813_v45 = vpop.permute.xlu0 %1267 }
 0x723   :  { %2365 = vrsqrt.f32 %v1305_v43  ;;  %v1532_v46 = vmul.f32 %v2811_v44, %v2769_v59  ;;  %v1531_v47 = vmul.f32 %v2813_v45, %v2765_v21  ;;  %v2020_v21 = vld [vmem:[%s3053_s14 + $0x6] ss:$0 sm:$0xff]  ;;  %v2033_v43 = vld [vmem:[%s3053_s14 + $0x9] ss:$0 sm:$0xff] }
 0x725   :  { %v1540_v48 = vsel %vm105_vm1, %v1532_v46, 0.0  ;;  %v1533_v49 = vsel %vm105_vm1, %v1531_v47, 0.0 }
 0x726   :  { %v1541_v50 = vrot.slane %v1540_v48, 4  ;;  %v1534_v51 = vrot.slane %v1533_v49, 4  ;;  %v1550_v7 = vpop.permute.xlu1 %1549 }
 0x728   :  { %v1535_v57 = vadd.f32 %v1534_v51, %v1533_v49  ;;  %v1542_v53 = vadd.f32 %v1541_v50, %v1540_v48  ;;  %v2017_v50 = vld [vmem:[%s3048_s9] ss:$0 sm:$0xff] }
 0x72a   :  { %v1536_v61 = vrot.slane %v1535_v57, 2  ;;  %v1543_v62 = vrot.slane %v1542_v53, 2  ;;  %v1555_v15 = vpop.permute.xlu1 %1554 }
 0x72c   :  { %v2364_v34 = vpop.eup %2363  ;;  %v1537_v8 = vadd.f32 %v1536_v61, %v1535_v57  ;;  %v1544_v29 = vadd.f32 %v1543_v62, %v1542_v53 }
 0x72d   :  { %v1308_v55 = vmul.f32 %v2364_v34, %v1292_v14 }
 0x72e   :  { %v1538_v9 = vrot.slane %v1537_v8, 1  ;;  %v1545_v10 = vrot.slane %v1544_v29, 1 }
 0x72f   :  { %v1316_v59 = vmul.f32 %v2019_v56, %v1308_v55  ;;  %v1173_v55 = vmul.f32 %v2017_v50, %v2755_v54 }
 0x730   :  { %v2366_v20 = vpop.eup %2365  ;;  %v1539_v13 = vadd.f32 %v1538_v9, %v1537_v8  ;;  %v1546_v14 = vadd.f32 %v1545_v10, %v1544_v29  ;;  %v1756_v29 = vld [vmem:[%s3051_s12 + $0x8] sm:$0xff] }
 0x731   :  { %v1309_v58 = vmul.f32 %v2366_v20, %v1293_v23  ;;  %v2827_v63 = vadd.f32 %v2020_v21, %v1316_v59  ;;  %v1642_v23 = vld [vmem:[%s3050_s11] sm:$0xff]  ;;  %v1174_v20 = vmul.f32 %v2017_v50, %v2753_v52 }
 0x732   :  { %v1557_v19 = vmul.f32 %v1550_v7, %v1539_v13  ;;  %v1558_v22 = vmul.f32 %v1555_v15, %v1546_v14  ;;  %v2018_v59 = vld [vmem:[%s3053_s14 + $0x2] ss:$0 sm:$0xff] }
 0x733   :  { %v1317_v60 = vmul.f32 %v2019_v56, %v1309_v58  ;;  %v1175_v56 = vsel %vm105_vm1, %v1173_v55, 0.0  ;;  %v1178_v57 = vsel %vm105_vm1, %v1174_v20, 0.0  ;;  %v1190_v13 = vld [vmem:[%s3042_s3] sm:$0xff] }
 0x734   :  { %v1649_v24 = vsel %vm1648_vm7, %v1558_v22, %v1557_v19  ;;  %v1838_v50 = vld [vmem:[%s3052_s13] sm:$0xff] }
 0x735   :  { %v2829_v0 = vadd.f32 %v2020_v21, %v1317_v60 }
 0x737   :  { %v1326_v2 = vpack.c.bf16 %v2829_v0, %v2827_v63 }
 0x739   :  { %2227 = vmatmul.mubr.msk.bf16.vlgmr.msra.gmra.mxu0 %vm105_vm1, %v1326_v2 }
 0x73a   :  { %2243 = vmatpush3.msra.mxu0 %v1561_v4  ;;  %2246 = vmatprep.mubr.msk.f32.mxu0 %vm2428_vm0, %v2427_v1 }
 0x73b   :  { %2244 = vmatprep.subr.mxu0 %v2427_v1 }
 0x73c   :  { %2245 = vmatpush3.msra.mxu0 %v1560_v6  ;;  %v1755_v6 = vld [vmem:[%s3051_s12] sm:$0xff] }
 0x73d   :  { %2249 = vmatprep.subr.mxu0 %v2427_v1 }
 0x741   :  { %2247 = vmatmul.mubr.msk.f32.vlgmr.msra.gmra.mxu0 %vm1092_vm4, %v1559_v11 }
 0x742   :  { %2250 = vmatpush3.msra.mxu0 %v1645_v12  ;;  %2257 = vmatprep.mubr.msk.f32.mxu0 %vm2428_vm0, %v2427_v1  ;;  %v2025_v12 = vld [vmem:[%s3053_s14 + $0x4] ss:$0 sm:$0xff] }
 0x743   :  { %2251 = vmatprep.subr.mxu0 %v2427_v1 }
 0x744   :  { %2252 = vmatpush3.msra.mxu0 %v1644_v16 }
 0x745   :  { %2253 = vmatprep.subr.mxu0 %v2427_v1 }
 0x746   :  { %2254 = vmatpush3.msra.mxu0 %v1643_v17 }
 0x747   :  { %2255 = vmatprep.subr.mxu0 %v2427_v1 }
 0x748   :  { %2256 = vmatpush3.msra.mxu0 %v1642_v23 }
 0x749   :  { %2258 = vmatmul.mubr.msk.f32.vlgmr.msra.gmra.mxu0 %vm105_vm1, %v1649_v24  ;;  %2267 = vmatprep.subr.mxu0 %v2427_v1 }
 0x74a   :  { %2283 = vmatprep.mubr.msk.f32.mxu0 %vm2428_vm0, %v2427_v1 }
 0x7f9   :  { %v1387_v26 = vpop.f32.mrf.mxu0 }
 0x7fa   :  { %v1388_v30 = vadd.f32 %v2021_v33, %v1387_v26 }
 0x7fb   :  { %v2228_v27 = vpop.f32.mrf.mxu0 }
 0x7fc   :  { %v1394_v38 = vmax.f32 %v1388_v30, 0.0  ;;  %v1191_v27 = vld [vmem:[%s3042_s3 + $0x8] sm:$0xff]  ;;  %s2438_s3 = smov [#allocation2]  }
 0x7fd   :  { %v1390_v35 = vpop.f32.mrf.mxu0  ;;  %s1962_s0 = sshll.u32 %s2438_s3, 4  ;;  %s1963_s0 = int_to_ptr.vmem [resolvable:$true] %s1962_s0 }
 0x7fe   :  { %v1391_v36 = vadd.f32 %v2021_v33, %v1390_v35  ;;  %s2383_s30 = scalar_lea.vmem %s1963_s0, 256  ;;  %p2388_p1 = scmp.lt.s32.totalorder %s1963_s0, %s1963_s0 }
 0x7ff   :  { %v2229_v37 = vpop.f32.mrf.mxu0  ;;  %p2384_p0 = scmp.ne.s32.totalorder %s1963_s0, %s2383_s30  ;;  %p2389_p2 = scmp.lt.s32.totalorder %s2383_s30, %s2383_s30 }
 0x800   :  { %v1395_v39 = vmax.f32 %v1391_v36, 0.0  ;;  %v2036_v37 = vld [vmem:[%s3053_s14 + $0xc] ss:$0 sm:$0xff] }
 0x801   :  { %v1638_v40 = vpop.f32.mrf.mxu0  ;;  %p2390_p3 = por %p2389_p2, %p2388_p1 }
 0x802   :  { %v1396_v41 = vpack.c.bf16 %v1395_v39, %v1394_v38  ;;  %v1639_v46 = vadd.f32 %v2033_v43, %v1638_v40  ;;  %v2037_v39 = vld [vmem:[%s3053_s14 + $0xd] ss:$0 sm:$0xff]  ;;  %v1844_v43 = vld [vmem:[%s3052_s13 + $0x30] sm:$0xff] }
 0x803   :  { %v2248_v42 = vpop.f32.mrf.mxu0  ;;  %p2391_p4 = pnand %p2390_p3, %p2384_p0 }
 0x804   :  { %2239 = vmatmul.mubr.msk.bf16.vlgmr.msra.gmra.mxu1 %vm1436_vm8, %v1396_v41  ;;  %v1845_v42 = vld [vmem:[%s3052_s13 + $0x38] sm:$0xff] }
 0x805   :  { %2264 = vmatprep.mubr.msk.f32.mxu1 %vm2428_vm0, %v2427_v1  ;;  %2261 = vmatpush3.msra.mxu1 %v1756_v29  ;;  %v2989_v29 = vld [vmem:[%s3053_s14 + $0x8] ss:$0 sm:$0xff] }
 0x806   :  { %2262 = vmatprep.subr.mxu1 %v2427_v1  ;;  %2268 = vmatpush3.msra.mxu0 %v1845_v42 }
 0x807   :  { %2263 = vmatpush3.msra.mxu1 %v1755_v6  ;;  %2269 = vmatprep.subr.mxu0 %v2427_v1 }
 0x808   :  { %2270 = vmatpush3.msra.mxu0 %v1844_v43 }
 0x809   :  { %v1718_v47 = vpop.f32.mrf.mxu0  ;;  %2271 = vmatprep.subr.mxu0 %v2427_v1 }
 0x80a   :  { %v1722_v48 = vadd.f32 %v1718_v47, %v1639_v46  ;;  %v1843_v46 = vld [vmem:[%s3052_s13 + $0x28] sm:$0xff]  ;;  %v1842_v47 = vld [vmem:[%s3052_s13 + $0x20] sm:$0xff] }
 0x80b   :  { %v2259_v49 = vpop.f32.mrf.mxu0  ;;  %2272 = vmatpush3.msra.mxu0 %v1843_v46 }
 0x80c   :  { %v1723_v34 = vadd.f32 %v1722_v48, %v1559_v11  ;;  %2273 = vmatprep.subr.mxu0 %v2427_v1  ;;  %v1841_v48 = vld [vmem:[%s3052_s13 + $0x18] sm:$0xff]  ;;  %v1840_v49 = vld [vmem:[%s3052_s13 + $0x10] sm:$0xff] }
 0x80d   :  { %2274 = vmatpush3.msra.mxu0 %v1842_v47 }
 0x80e   :  { %v1727_v51 = vsel %vm1726_vm9, %v1723_v34, 0.0  ;;  %2275 = vmatprep.subr.mxu0 %v2427_v1 }
 0x80f   :  { %1728 = vadd.xlane.f32.xlu1 %v1727_v51  ;;  %2276 = vmatpush3.msra.mxu0 %v1841_v48 }
 0x810   :  { %2277 = vmatprep.subr.mxu0 %v2427_v1 }
 0x811   :  { %2278 = vmatpush3.msra.mxu0 %v1840_v49 }
 0x812   :  { %2279 = vmatprep.subr.mxu0 %v2427_v1 }
 0x813   :  { %1176 = vadd.xlane.f32.xlu1 %v1175_v56 }
 0x817   :  { %1179 = vadd.xlane.f32.xlu1 %v1178_v57 }
 0x898   :  { %v1729_v53 = vpop.xlane.xlu1 %1728 }
 0x899   :  { %v1731_v58 = vmul.f32 0.0625, %v1729_v53 }
 0x89b   :  { %v1732_v21 = vsub.f32 %v1723_v34, %v1731_v58  ;;  %v1839_v34 = vld [vmem:[%s3052_s13 + $0x8] sm:$0xff] }
 0x89c   :  { %v1177_v60 = vpop.xlane.xlu1 %1176  ;;  %2280 = vmatpush3.msra.mxu0 %v1839_v34  ;;  %v2038_v58 = vld [vmem:[%s3053_s14 + $0xa] ss:$0 sm:$0xff] }
 0x89d   :  { %v1188_v61 = vadd.f32 %v2018_v59, %v1177_v60  ;;  %v1733_v62 = vmul.f32 %v1732_v21, %v1732_v21  ;;  %2281 = vmatprep.subr.mxu0 %v2427_v1 }
 0x89e   :  { %2282 = vmatpush3.msra.mxu0 %v1838_v50 }
 0x89f   :  { %v1192_v54 = vadd.f32 1.0, %v1188_v61  ;;  %v1734_v2 = vsel %vm1726_vm9, %v1733_v62, 0.0 }
 0x8a0   :  { %1735 = vadd.xlane.f32.xlu0 %v1734_v2  ;;  %v1180_v52 = vpop.xlane.xlu1 %1179 }
 0x8a1   :  { %1196 = vperm.xlu1 %2316, %v1192_v54   ;;  %v1189_v4 = vadd.f32 %v2018_v59, %v1180_v52 }
 0x8a3   :  { %v1193_v8 = vadd.f32 1.0, %v1189_v4  ;;  %v2984_v4 = vld [vmem:[%s3053_s14 + $0x7] ss:$0 sm:$0xff] }
 0x8b6   :  { %1201 = vperm.xlu0 %2315, %v1193_v8  }
 0x8c4   :  { %v1474_v7 = vpop.f32.mrf.mxu1 }
 0x8c5   :  { %v1475_v15 = vadd.f32 %v2025_v12, %v1474_v7 }
 0x8c6   :  { %v2240_v9 = vpop.f32.mrf.mxu1 }
 0x8c7   :  { %v1481_v23 = vadd.f32 %v1475_v15, %v2827_v63 }
 0x8c8   :  { %v1477_v10 = vpop.f32.mrf.mxu1 }
 0x8c9   :  { %v1478_v19 = vadd.f32 %v2025_v12, %v1477_v10  ;;  %v1485_v24 = vsel %vm105_vm1, %v1481_v23, 0.0 }
 0x8ca   :  { %v2241_v11 = vpop.f32.mrf.mxu1 }
 0x8cb   :  { %v2923_v25 = vadd.f32 %v1478_v19, %v2829_v0 }
 0x8cd   :  { %v1488_v18 = vsel %vm105_vm1, %v2923_v25, 0.0 }
 0x91c   :  { %v1197_v14 = vpop.permute.xlu1 %1196 }
 0x91d   :  { %v2915_v16 = vmul.f32 %v1197_v14, %v1190_v13 }
 0x91f   :  { %v1206_v17 = vmul.f32 %v2915_v16, %v2915_v16 }
 0x921   :  { %v1209_v22 = vsel %vm1208_vm10, %v1206_v17, 0.0 }
 0x922   :  { %1210 = vadd.xlane.f32.xlu1 %v1209_v22  ;;  %v2040_v22 = vld [vmem:[%s3053_s14 + $0xb] ss:$0 sm:$0xff] }
 0x926   :  { %1486 = vadd.xlane.f32.xlu1 %v1485_v24 }
 0x929   :  { %v1736_v28 = vpop.xlane.xlu0 %1735 }
 0x92a   :  { %v1737_v33 = vmul.f32 0.0625, %v1736_v28  ;;  %1489 = vadd.xlane.f32.xlu1 %v1488_v18 }
 0x92c   :  { %v1738_v26 = vadd.f32 1e-05, %v1737_v33 }
 0x92e   :  { %2367 = vrsqrt.f32 %v1738_v26 }
 0x931   :  { %v1202_v63 = vpop.permute.xlu0 %1201 }
 0x932   :  { %v2930_v30 = vmul.f32 %v1202_v63, %v1191_v27 }
 0x934   :  { %v1207_v0 = vmul.f32 %v2930_v30, %v2930_v30 }
 0x936   :  { %v1212_v35 = vsel %vm1208_vm10, %v1207_v0, 0.0 }
 0x937   :  { %1213 = vadd.xlane.f32.xlu0 %v1212_v35 }
 0x93b   :  { %v2368_v36 = vpop.eup %2367 }
 0x93c   :  { %v1740_v38 = vmul.f32 %v2368_v36, %v1732_v21 }
 0x93e   :  { %v1747_v40 = vmul.f32 %v2036_v37, %v1740_v38 }
 0x940   :  { %v2941_v41 = vadd.f32 %v2037_v39, %v1747_v40 }
 0x942   :  { %2265 = vmatmul.mubr.msk.f32.vlgmr.msra.gmra.mxu1 %vm1092_vm4, %v2941_v41 }
 0x9ab   :  { %v1211_v51 = vpop.xlane.xlu1 %1210 }
 0x9ac   :  { %v1215_v10 = vadd.f32 1e-12, %v1211_v51 }
 0x9ae   :  { %vm1219_vm11 = vcmp.eq.f32.partialorder %v1215_v10, inf  ;;  %v1222_v14 = vand.u32 2147483648, %v1215_v10  ;;  %vm1221_vm12 = vcmp.eq.f32.partialorder %v1215_v10, 0.0 }
 0x9af   :  { %v1487_v55 = vpop.xlane.xlu1 %1486 }
 0x9b0   :  { %v1491_v56 = vmul.f32 0.03125, %v1487_v55 }
 0x9b2   :  { %v1493_v20 = vsub.f32 %v1481_v23, %v1491_v56 }
 0x9b3   :  { %v1490_v61 = vpop.xlane.xlu1 %1489 }
 0x9b4   :  { %v1495_v57 = vmul.f32 %v1493_v20, %v1493_v20  ;;  %v1492_v19 = vmul.f32 0.03125, %v1490_v61 }
 0x9b6   :  { %v1497_v53 = vsel %vm105_vm1, %v1495_v57, 0.0  ;;  %v1494_v28 = vsub.f32 %v2923_v25, %v1492_v19 }
 0x9b7   :  { %1498 = vadd.xlane.f32.xlu1 %v1497_v53 }
 0x9b8   :  { %v1496_v0 = vmul.f32 %v1494_v28, %v1494_v28 }
 0x9ba   :  { %v1500_v35 = vsel %vm105_vm1, %v1496_v0, 0.0 }
 0x9c0   :  { %v1214_v42 = vpop.xlane.xlu0 %1213 }
 0x9c1   :  { %v1216_v43 = vadd.f32 1e-12, %v1214_v42 }
 0x9c3   :  { %vm1226_vm13 = vcmp.eq.f32.partialorder %v1216_v43, inf  ;;  %v1229_v48 = vand.u32 2147483648, %v1216_v43  ;;  %vm1228_vm14 = vcmp.eq.f32.partialorder %v1216_v43, 0.0 }
 0xa02   :  { %v1833_v59 = vpop.f32.mrf.mxu1 }
 0xa03   :  { %v1834_v21 = vadd.f32 %v2038_v58, %v1833_v59 }
 0xa04   :  { %v2266_v1 = vpop.f32.mrf.mxu1 }
 0xa05   :  { %v1837_v60 = vmax.f32 %v1834_v21, 0.0 }
 0xa07   :  { %2284 = vmatmul.mubr.msk.f32.vlgmr.msra.gmra.mxu0 %vm1436_vm8, %v1837_v60 }
 0xa40   :  { %v1499_v62 = vpop.xlane.xlu1 %1498 }
 0xa41   :  { %v1503_v54 = vmul.f32 0.03125, %v1499_v62 }
 0xa43   :  { %v1505_v2 = vadd.f32 1e-05, %v1503_v54 }
 0xa45   :  { %2369 = vrsqrt.f32 %v1505_v2 }
 0xa46   :  { %2371 = vrsqrt.f32 %v1215_v10 }
 0xa47   :  { %2373 = vrsqrt.f32 %v1216_v43 }
 0xa52   :  { %v2370_v52 = vpop.eup %2369 }
 0xa53   :  { %v1509_v8 = vmul.f32 %v2370_v52, %v1493_v20  ;;  %v2372_v11 = vpop.eup %2371 }
 0xa54   :  { %v1218_v12 = vmul.f32 %v2372_v11, %v1215_v10 }
 0xa55   :  { %v1517_v6 = vmul.f32 %v2984_v4, %v1509_v8 }
 0xa56   :  { %v1220_v13 = vsel %vm1219_vm11, %v1215_v10, %v1218_v12 }
 0xa57   :  { %v1525_v7 = vadd.f32 %v2989_v29, %v1517_v6  ;;  %v1223_v15 = vsel %vm1221_vm12, %v1222_v14, %v1220_v13 }
 0xa58   :  { %v1231_v17 = vmul.f32 %v1223_v15, %v2778_v3 }
 0xa59   :  { %v1527_v9 = vmul.f32 %v1525_v7, %v2813_v45 }
 0xa5a   :  { %v1233_v23 = vsel %vm60_vm6, %v1231_v17, 0.0 }
 0xa5b   :  { %1529 = vst.msk [vmem:[#allocation2] sm:$0xff] %vm105_vm1, %v1527_v9  ;;  %v1234_v26 = vrot.slane %v1233_v23, 4 }
 0xa5d   :  { %v1235_v3 = vadd.f32 %v1234_v26, %v1233_v23 }
 0xa5f   :  { %v1236_v36 = vrot.slane %v1235_v3, 2 }
 0xa61   :  { %v1237_v37 = vadd.f32 %v1236_v36, %v1235_v3 }
 0xa63   :  { %v1238_v38 = vrot.slane %v1237_v37, 1 }
 0xa65   :  { %v1239_v39 = vadd.f32 %v1238_v38, %v1237_v37 }
 0xa67   :  { %v1247_v40 = vmul.f32 %v2792_v31, %v1239_v39 }
 0xa69   :  { %v1249_v25 = vadd.f32 1e-08, %v1247_v40 }
 0xac7   :  { %v1922_v24 = vpop.f32.mrf.mxu0 }
 0xac8   :  { %v1923_v18 = vadd.f32 %v2040_v22, %v1922_v24 }
 0xac9   :  { %v2285_v33 = vpop.f32.mrf.mxu0 }
 0xaca   :  { %v1926_v27 = vadd.f32 %v1923_v18, %v2941_v41  ;;  %v2374_v41 = vpop.eup %2373 }
 0xacb   :  { %v1225_v46 = vmul.f32 %v2374_v41, %v1216_v43 }
 0xacc   :  { %v1929_v63 = vsel %vm1726_vm9, %v1926_v27, 0.0 }
 0xacd   :  { %1930 = vadd.xlane.f32.xlu0 %v1929_v63  ;;  %v1227_v47 = vsel %vm1226_vm13, %v1216_v43, %v1225_v46 }
 0xace   :  { %v1230_v49 = vsel %vm1228_vm14, %v1229_v48, %v1227_v47 }
 0xacf   :  { %v1232_v34 = vmul.f32 %v1230_v49, %v2785_v5 }
 0xad1   :  { %1501 = vadd.xlane.f32.xlu0 %v1500_v35  ;;  %v1240_v50 = vsel %vm60_vm6, %v1232_v34, 0.0 }
 0xad2   :  { %v1241_v51 = vrot.slane %v1240_v50, 4 }
 0xad4   :  { %v1242_v55 = vadd.f32 %v1241_v51, %v1240_v50 }
 0xad6   :  { %v1243_v57 = vrot.slane %v1242_v55, 2 }
 0xad8   :  { %v1244_v60 = vadd.f32 %v1243_v57, %v1242_v55 }
 0xada   :  { %v1245_v61 = vrot.slane %v1244_v60, 1 }
 0xadc   :  { %v1246_v5 = vadd.f32 %v1245_v61, %v1244_v60 }
 0xade   :  { %v1248_v54 = vmul.f32 %v2796_v32, %v1246_v5 }
 0xae0   :  { %v1250_v52 = vadd.f32 1e-08, %v1248_v54 }
 0xae7   :  { %1253 = vperm.xlu0 %2315, %v1249_v25  }
 0xb56   :  { %v1931_v56 = vpop.xlane.xlu0 %1930 }
 0xb57   :  { %v1932_v31 = vmul.f32 0.0625, %v1931_v56 }
 0xb59   :  { %v1933_v20 = vsub.f32 %v1926_v27, %v1932_v31 }
 0xb5a   :  { %v1502_v53 = vpop.xlane.xlu0 %1501 }
 0xb5b   :  { %v1504_v58 = vmul.f32 0.03125, %v1502_v53  ;;  %v1934_v59 = vmul.f32 %v1933_v20, %v1933_v20 }
 0xb5d   :  { %v1506_v21 = vadd.f32 1e-05, %v1504_v58  ;;  %v1935_v1 = vsel %vm1726_vm9, %v1934_v59, 0.0 }
 0xb5e   :  { %1936 = vadd.xlane.f32.xlu1 %v1935_v1 }
 0xb5f   :  { %2375 = vrsqrt.f32 %v1506_v21 }
 0xb62   :  { %v1254_v62 = vpop.permute.xlu0 %1253 }
 0xb63   :  { %2377 = vrcp.f32 %v1254_v62 }
 0xb6c   :  { %v2376_v2 = vpop.eup %2375 }
 0xb6d   :  { %v1510_v8 = vmul.f32 %v2376_v2, %v1494_v28 }
 0xb6f   :  { %1258 = vperm.xlu1 %2316, %v1250_v52   ;;  %v1518_v6 = vmul.f32 %v2984_v4, %v1510_v8 }
 0xb70   :  { %v2378_v7 = vpop.eup %2377 }
 0xb71   :  { %v1262_v9 = vmul.f32 %v2378_v7, %v2915_v16  ;;  %v1526_v10 = vadd.f32 %v2989_v29, %v1518_v6 }
 0xb73   :  { %v1275_v11 = vmul.f32 %v2813_v45, %v1262_v9  ;;  %v1528_v12 = vmul.f32 %v1526_v10, %v2811_v44 }
 0xb75   :  { %1277 = vst.msk [vmem:[%s3055_s16] sm:$0xff] %vm1208_vm10, %v1275_v11 }
 0xb76   :  { %1530 = vst.msk [vmem:[#allocation2 + $0x8] sm:$0xff] %vm105_vm1, %v1528_v12 }
 0xb77   :  { %2394 = shalt.err (!%p2391_p4)
}
 0xb78   :  { %s2439_s18 = smov 128   ;;  %v2042_v13 = vld [vmem:[%s3053_s14 + $0xe] ss:$0 sm:$0xff]  ;;  %v2043_v19 = vld [vmem:[%s3053_s14 + $0xf] ss:$0 sm:$0xff] }
 0xb79   :  { %1968 = dma.vmem_to_hbm [thread:$0]  %s1963_s0, 256, %s3054_s15, [#allocation3], %s2439_s18, %s2439_s18, %s2434_s2  }
 0xb7a   :  { %s2440_s15 = smov [#allocation4]  }
 0xb7b   :  { %s1977_s2 = sshll.u32 %s2440_s15, 4  ;;  %s1978_s2 = int_to_ptr.vmem [resolvable:$true] %s1977_s2 }
 0xb7c   :  { %s2403_s22 = scalar_lea.vmem %s1978_s2, 32  ;;  %p2408_p6 = scmp.lt.s32.totalorder %s1978_s2, %s1978_s2 }
 0xb7d   :  { %p2404_p5 = scmp.ne.s32.totalorder %s1978_s2, %s2403_s22  ;;  %p2409_p7 = scmp.lt.s32.totalorder %s2403_s22, %s2403_s22 }
 0xb7f   :  { %p2410_p8 = por %p2409_p7, %p2408_p6 }
 0xb81   :  { %p2411_p9 = pnand %p2410_p8, %p2404_p5 }
 0xbe7   :  { %v1937_v32 = vpop.xlane.xlu1 %1936 }
 0xbe8   :  { %v1938_v45 = vmul.f32 0.0625, %v1937_v32 }
 0xbea   :  { %v1939_v16 = vadd.f32 1e-05, %v1938_v45 }
 0xbeb   :  { %v1259_v4 = vpop.permute.xlu1 %1258 }
 0xbec   :  { %2379 = vrsqrt.f32 %v1939_v16 }
 0xbed   :  { %2381 = vrcp.f32 %v1259_v4 }
 0xbf9   :  { %v2380_v29 = vpop.eup %2379 }
 0xbfa   :  { %v2382_v14 = vpop.eup %2381  ;;  %v1941_v15 = vmul.f32 %v2380_v29, %v1933_v20 }
 0xbfb   :  { %v1264_v17 = vmul.f32 %v2382_v14, %v2930_v30 }
 0xbfc   :  { %v1948_v22 = vmul.f32 %v2042_v13, %v1941_v15 }
 0xbfd   :  { %v1276_v23 = vmul.f32 %v2811_v44, %v1264_v17 }
 0xbfe   :  { %v1955_v24 = vadd.f32 %v2043_v19, %v1948_v22 }
 0xbff   :  { %1278 = vst.msk [vmem:[%s3055_s16 + $0x8] sm:$0xff] %vm1208_vm10, %v1276_v23 }
 0xc00   :  { %1956 = vst.msk [vmem:[#allocation4] sm:$0x3] %vm1726_vm9, %v1955_v24 }
 0xc01   :  { %2414 = shalt.err (!%p2411_p9)
}
 0xc02   :  { %1980 = dma.vmem_to_hbm [thread:$0]  %s1978_s2, 32, %s3056_s17, [#allocation5]  }
 0xc03   :  { %2423 = dma.done.wait [#allocation3], 256  }
 0xc04   :  { %2424 = vsyncadd [#allocation3], 4294967040 }
 0xc05   :  { %2425 = dma.done.wait [#allocation5], 32  }
 0xc06   :  { %2426 = vsyncadd [#allocation5], 4294967264 }
 0xc07   :  { %1989 = vsyncpa [#allocation3], 1 }
 0xc08   :  { %1990 = vsyncpa [#allocation5], 1 }

</bundles_post_ra>
